<compile_context>
chip_gen: v7x
topology: tpu7x:2x2x1
jax: 0.10.0
libtpu: 0.0.40
codegen_flags: <defaults>
</compile_context>

<pallas_src>
import jax
import jax.numpy as jnp
from jax.experimental import pallas as pl
from jax.experimental.pallas import tpu as pltpu


_HIGHEST = jax.lax.Precision.HIGHEST


def _dot(a, b):
    # f32 MXU matmul with f32 accumulation (matches the reference numerics).
    return jnp.dot(a, b, preferred_element_type=jnp.float32, precision=_HIGHEST)


# -----------------------------------------------------------------------------
# Fused decoder kernel: embedding gather + unrolled GRU stack + FC
# -----------------------------------------------------------------------------
def _make_decoder_kernel(num_layers: int, batch: int):
    def kernel(tok_ref, emb_ref, hid_ref, *rest):
        # rest = 8 refs per layer, then fc_w, fc_b, then outputs (out, hid_out)
        n_lp = 8 * num_layers
        layer_refs = rest[:n_lp]
        fc_w_ref, fc_b_ref, out_ref, hid_out_ref = rest[n_lp:]

        # ---- embedding gather (token ids in SMEM, table resident in VMEM) ----
        rows = [emb_ref[pl.ds(tok_ref[b], 1), :] for b in range(batch)]
        x = jnp.concatenate(rows, axis=0) if batch > 1 else rows[0]   # (B, E)

        # ---- GRU stack, fully unrolled; PyTorch gate order [r, z, n] ----
        for l in range(num_layers):
            w_r, w_z, w_in, w_hn, b_r, b_z, b_in, b_hn = (
                layer_refs[8 * l: 8 * (l + 1)])
            h = hid_ref[l]                                   # (B, H)

            # merged gate GEMMs: K = in_dim + H (single MXU pass each)
            xh = jnp.concatenate([x, h], axis=-1)            # (B, in_dim + H)
            r = jax.nn.sigmoid(_dot(xh, w_r[...]) + b_r[...])
            z = jax.nn.sigmoid(_dot(xh, w_z[...]) + b_z[...])
            n = jnp.tanh(_dot(x, w_in[...]) + b_in[...]
                         + r * (_dot(h, w_hn[...]) + b_hn[...]))

            h_new = (1.0 - z) * n + z * h                    # (B, H)
            hid_out_ref[l] = h_new                           # in-place (aliased)
            x = h_new                                        # feed next layer

        # ---- final Linear ----
        out_ref[...] = _dot(x, fc_w_ref[...]) + fc_b_ref[...]

    return kernel


@jax.jit
def simple_decoder_forward(params, tokens, hidden):
    """tokens: (B, 1) int32 ; hidden: (num_layers, B, H) f32 (PyTorch layout)."""
    num_layers, B, H = hidden.shape
    V = params["fc_w"].shape[1]

    flat = []
    for p in params["gru"]:
        flat += [p["w_r"], p["w_z"], p["w_in"], p["w_hn"],
                 p["b_r"], p["b_z"], p["b_in"], p["b_hn"]]

    tok_flat = tokens.reshape(-1).astype(jnp.int32)          # (B,) for 1-D SMEM
    inputs = [tok_flat, params["embedding"], hidden, *flat,
              params["fc_w"], params["fc_b"]]

    smem = pl.BlockSpec(memory_space=pltpu.MemorySpace.SMEM)
    vmem = pl.BlockSpec(memory_space=pltpu.MemorySpace.VMEM)

    out, hid_new = pl.pallas_call(
        _make_decoder_kernel(num_layers, B),
        out_shape=(jax.ShapeDtypeStruct((B, V), jnp.float32),
                   jax.ShapeDtypeStruct((num_layers, B, H), jnp.float32)),
        in_specs=[smem] + [vmem] * (len(inputs) - 1),
        out_specs=(vmem, vmem),
        input_output_aliases={2: 1},   # hidden state updated in place
    )(*inputs)
    return out, hid_new


# -----------------------------------------------------------------------------
# Parameter construction (PyTorch-style init, weights pre-laid-out per gate)
# -----------------------------------------------------------------------------
def init_params(key, configure):
    num_words = configure["num_words"]
    emb_dim = configure["embedding_dim"]
    H = configure["hidden_size"]
    num_layers = configure["num_layers"]

    keys = jax.random.split(key, 1 + 4 * num_layers + 2)
    ki = iter(keys)

    params = {"embedding": jax.random.normal(next(ki), (num_words, emb_dim),
                                             dtype=jnp.float32)}

    bound = 1.0 / float(H) ** 0.5
    gru_layers = []
    for layer in range(num_layers):
        in_dim = emb_dim if layer == 0 else H
        w_ih = jax.random.uniform(next(ki), (3 * H, in_dim),
                                  minval=-bound, maxval=bound, dtype=jnp.float32)
        w_hh = jax.random.uniform(next(ki), (3 * H, H),
                                  minval=-bound, maxval=bound, dtype=jnp.float32)
        b_ih = jax.random.uniform(next(ki), (3 * H,),
                                  minval=-bound, maxval=bound, dtype=jnp.float32)
        b_hh = jax.random.uniform(next(ki), (3 * H,),
                                  minval=-bound, maxval=bound, dtype=jnp.float32)

        # PyTorch gate order along dim 0: [r, z, n]
        w_ir, w_iz, w_in = w_ih[:H], w_ih[H:2 * H], w_ih[2 * H:]
        w_hr, w_hz, w_hn = w_hh[:H], w_hh[H:2 * H], w_hh[2 * H:]
        gru_layers.append({
            # merged [x | h] weights, pre-transposed for xh @ W : (in_dim+H, H)
            "w_r": jnp.concatenate([w_ir.T, w_hr.T], axis=0),
            "w_z": jnp.concatenate([w_iz.T, w_hz.T], axis=0),
            # n-gate weights stay separate (r gates the hidden contribution)
            "w_in": w_in.T,                                  # (in_dim, H)
            "w_hn": w_hn.T,                                  # (H, H)
            # r/z biases pre-summed; n-gate biases kept separate
            "b_r": (b_ih[:H] + b_hh[:H]).reshape(1, H),
            "b_z": (b_ih[H:2 * H] + b_hh[H:2 * H]).reshape(1, H),
            "b_in": b_ih[2 * H:].reshape(1, H),
            "b_hn": b_hh[2 * H:].reshape(1, H),
        })
    params["gru"] = gru_layers

    w_fc = jax.random.uniform(next(ki), (num_words, H),
                              minval=-bound, maxval=bound, dtype=jnp.float32)
    b_fc = jax.random.uniform(next(ki), (num_words,),
                              minval=-bound, maxval=bound, dtype=jnp.float32)
    params["fc_w"] = w_fc.T                                  # (H, num_words)
    params["fc_b"] = b_fc.reshape(1, -1)
    return params


# -----------------------------------------------------------------------------
# Pure-JAX reference (standard, un-merged PyTorch GRU math) for correctness
# -----------------------------------------------------------------------------
def reference_forward(params, tokens, hidden):
    x = jnp.take(params["embedding"], tokens[:, 0], axis=0)   # (B, E)
    new_hidden = []
    dot = lambda a, b: jnp.dot(a, b, precision=_HIGHEST)
    for l, p in enumerate(params["gru"]):
        h = hidden[l]
        in_dim = x.shape[-1]
        w_ir, w_hr = p["w_r"][:in_dim], p["w_r"][in_dim:]
        w_iz, w_hz = p["w_z"][:in_dim], p["w_z"][in_dim:]
        r = jax.nn.sigmoid(dot(x, w_ir) + dot(h, w_hr) + p["b_r"])
        z = jax.nn.sigmoid(dot(x, w_iz) + dot(h, w_hz) + p["b_z"])
        n = jnp.tanh(dot(x, p["w_in"]) + p["b_in"]
                     + r * (dot(h, p["w_hn"]) + p["b_hn"]))
        h_new = (1.0 - z) * n + z * h
        new_hidden.append(h_new)
        x = h_new
    out = dot(x, params["fc_w"]) + params["fc_b"]
    return out, jnp.stack(new_hidden, axis=0)


if __name__ == "__main__":
    configure = {
        "num_words": 32,
        "embedding_dim": 16,
        "hidden_size": 32,
        "num_layers": 2,
    }
    B = 2  # batch
    S = 1  # seq len (forced to 1 by fc(hidden_size, num_words) on out.view(B,-1))

    key = jax.random.PRNGKey(0)
    k_params, k_tok, k_hid = jax.random.split(key, 3)

    params = init_params(k_params, configure)
    tokens = jax.random.randint(k_tok, (B, S), 0, configure["num_words"],
                                dtype=jnp.int32)
    hidden0 = jax.random.normal(
        k_hid, (configure["num_layers"], B, configure["hidden_size"]),
        dtype=jnp.float32)

    out, hidden1 = simple_decoder_forward(params, tokens, hidden0)
    out, hidden1 = jax.block_until_ready((out, hidden1))

    ref_out, ref_hidden = reference_forward(params, tokens, hidden0)
    assert out.shape == (B, configure["num_words"])
    assert hidden1.shape == (configure["num_layers"], B, configure["hidden_size"])
    assert jnp.allclose(out, ref_out, atol=1e-4, rtol=1e-4)
    assert jnp.allclose(hidden1, ref_hidden, atol=1e-4, rtol=1e-4)

    print("KERNEL_OK")
</pallas_src>

<mosaic_0001>
module attributes {stable_mosaic.version = 11 : i64} {
  func.func @kernel(%arg0: memref<2xi32, #tpu.memory_space<smem>>, %arg1: memref<32x16xf32, #tpu.memory_space<vmem>>, %arg2: memref<2x2x32xf32, #tpu.memory_space<vmem>>, %arg3: memref<48x32xf32, #tpu.memory_space<vmem>>, %arg4: memref<48x32xf32, #tpu.memory_space<vmem>>, %arg5: memref<16x32xf32, #tpu.memory_space<vmem>>, %arg6: memref<32x32xf32, #tpu.memory_space<vmem>>, %arg7: memref<1x32xf32, #tpu.memory_space<vmem>>, %arg8: memref<1x32xf32, #tpu.memory_space<vmem>>, %arg9: memref<1x32xf32, #tpu.memory_space<vmem>>, %arg10: memref<1x32xf32, #tpu.memory_space<vmem>>, %arg11: memref<64x32xf32, #tpu.memory_space<vmem>>, %arg12: memref<64x32xf32, #tpu.memory_space<vmem>>, %arg13: memref<32x32xf32, #tpu.memory_space<vmem>>, %arg14: memref<32x32xf32, #tpu.memory_space<vmem>>, %arg15: memref<1x32xf32, #tpu.memory_space<vmem>>, %arg16: memref<1x32xf32, #tpu.memory_space<vmem>>, %arg17: memref<1x32xf32, #tpu.memory_space<vmem>>, %arg18: memref<1x32xf32, #tpu.memory_space<vmem>>, %arg19: memref<32x32xf32, #tpu.memory_space<vmem>>, %arg20: memref<1x32xf32, #tpu.memory_space<vmem>>, %arg21: memref<2x32xf32, #tpu.memory_space<vmem>>, %arg22: memref<2x2x32xf32, #tpu.memory_space<vmem>>) attributes {dimension_semantics = [], scalar_prefetch = 0 : i64, scratch_operands = 0 : i64, tpu.core_type = #tpu.core_type<tc>} {
    %c0 = arith.constant 0 : index
    %0 = memref.load %arg0[%c0] : memref<2xi32, #tpu.memory_space<smem>>
    %1 = arith.index_cast %0 : i32 to index
    %c0_0 = arith.constant 0 : index
    %2 = vector.load %arg1[%1, %c0_0] : memref<32x16xf32, #tpu.memory_space<vmem>>, vector<1x16xf32>
    %c1 = arith.constant 1 : index
    %3 = memref.load %arg0[%c1] : memref<2xi32, #tpu.memory_space<smem>>
    %4 = arith.index_cast %3 : i32 to index
    %c0_1 = arith.constant 0 : index
    %5 = vector.load %arg1[%4, %c0_1] : memref<32x16xf32, #tpu.memory_space<vmem>>, vector<1x16xf32>
    %6 = tpu.concatenate %2, %5 in 0 : vector<1x16xf32>, vector<1x16xf32> -> vector<2x16xf32>
    %c0_2 = arith.constant 0 : index
    %c0_3 = arith.constant 0 : index
    %c0_4 = arith.constant 0 : index
    %7 = vector.load %arg2[%c0_2, %c0_3, %c0_4] : memref<2x2x32xf32, #tpu.memory_space<vmem>>, vector<1x2x32xf32>
    %8 = vector.shape_cast %7 : vector<1x2x32xf32> to vector<2x32xf32>
    %9 = tpu.concatenate %6, %8 in 1 : vector<2x16xf32>, vector<2x32xf32> -> vector<2x48xf32>
    %c0_5 = arith.constant 0 : index
    %c0_6 = arith.constant 0 : index
    %10 = vector.load %arg3[%c0_5, %c0_6] : memref<48x32xf32, #tpu.memory_space<vmem>>, vector<48x32xf32>
    %cst = arith.constant dense<0.000000e+00> : vector<2x32xf32>
    %11 = tpu.matmul %9, %10, %cst {dimension_numbers = #tpu.dot_dimension_numbers<[1], [0], [0], [1], [0, 0, 1, 1], [], []>, precision = #tpu.contract_precision<fp32>} : vector<2x48xf32>, vector<48x32xf32>, vector<2x32xf32> -> vector<2x32xf32>
    %c0_7 = arith.constant 0 : index
    %c0_8 = arith.constant 0 : index
    %12 = vector.load %arg7[%c0_7, %c0_8] : memref<1x32xf32, #tpu.memory_space<vmem>>, vector<1x32xf32>
    %13 = vector.broadcast %12 : vector<1x32xf32> to vector<2x32xf32>
    %14 = arith.addf %11, %13 : vector<2x32xf32>
    %15 = arith.negf %14 : vector<2x32xf32>
    %16 = math.exp %15 : vector<2x32xf32>
    %cst_9 = arith.constant 1.000000e+00 : f32
    %17 = vector.broadcast %cst_9 : f32 to vector<2x32xf32>
    %18 = arith.addf %17, %16 : vector<2x32xf32>
    %19 = arith.divf %17, %18 : vector<2x32xf32>
    %c0_10 = arith.constant 0 : index
    %c0_11 = arith.constant 0 : index
    %20 = vector.load %arg4[%c0_10, %c0_11] : memref<48x32xf32, #tpu.memory_space<vmem>>, vector<48x32xf32>
    %cst_12 = arith.constant dense<0.000000e+00> : vector<2x32xf32>
    %21 = tpu.matmul %9, %20, %cst_12 {dimension_numbers = #tpu.dot_dimension_numbers<[1], [0], [0], [1], [0, 0, 1, 1], [], []>, precision = #tpu.contract_precision<fp32>} : vector<2x48xf32>, vector<48x32xf32>, vector<2x32xf32> -> vector<2x32xf32>
    %c0_13 = arith.constant 0 : index
    %c0_14 = arith.constant 0 : index
    %22 = vector.load %arg8[%c0_13, %c0_14] : memref<1x32xf32, #tpu.memory_space<vmem>>, vector<1x32xf32>
    %23 = vector.broadcast %22 : vector<1x32xf32> to vector<2x32xf32>
    %24 = arith.addf %21, %23 : vector<2x32xf32>
    %25 = arith.negf %24 : vector<2x32xf32>
    %26 = math.exp %25 : vector<2x32xf32>
    %cst_15 = arith.constant 1.000000e+00 : f32
    %27 = vector.broadcast %cst_15 : f32 to vector<2x32xf32>
    %28 = arith.addf %27, %26 : vector<2x32xf32>
    %29 = arith.divf %27, %28 : vector<2x32xf32>
    %c0_16 = arith.constant 0 : index
    %c0_17 = arith.constant 0 : index
    %30 = vector.load %arg5[%c0_16, %c0_17] : memref<16x32xf32, #tpu.memory_space<vmem>>, vector<16x32xf32>
    %cst_18 = arith.constant dense<0.000000e+00> : vector<2x32xf32>
    %31 = tpu.matmul %6, %30, %cst_18 {dimension_numbers = #tpu.dot_dimension_numbers<[1], [0], [0], [1], [0, 0, 1, 1], [], []>, precision = #tpu.contract_precision<fp32>} : vector<2x16xf32>, vector<16x32xf32>, vector<2x32xf32> -> vector<2x32xf32>
    %c0_19 = arith.constant 0 : index
    %c0_20 = arith.constant 0 : index
    %32 = vector.load %arg9[%c0_19, %c0_20] : memref<1x32xf32, #tpu.memory_space<vmem>>, vector<1x32xf32>
    %33 = vector.broadcast %32 : vector<1x32xf32> to vector<2x32xf32>
    %34 = arith.addf %31, %33 : vector<2x32xf32>
    %c0_21 = arith.constant 0 : index
    %c0_22 = arith.constant 0 : index
    %35 = vector.load %arg6[%c0_21, %c0_22] : memref<32x32xf32, #tpu.memory_space<vmem>>, vector<32x32xf32>
    %cst_23 = arith.constant dense<0.000000e+00> : vector<2x32xf32>
    %36 = tpu.matmul %8, %35, %cst_23 {dimension_numbers = #tpu.dot_dimension_numbers<[1], [0], [0], [1], [0, 0, 1, 1], [], []>, precision = #tpu.contract_precision<fp32>} : vector<2x32xf32>, vector<32x32xf32>, vector<2x32xf32> -> vector<2x32xf32>
    %c0_24 = arith.constant 0 : index
    %c0_25 = arith.constant 0 : index
    %37 = vector.load %arg10[%c0_24, %c0_25] : memref<1x32xf32, #tpu.memory_space<vmem>>, vector<1x32xf32>
    %38 = vector.broadcast %37 : vector<1x32xf32> to vector<2x32xf32>
    %39 = arith.addf %36, %38 : vector<2x32xf32>
    %40 = arith.mulf %19, %39 : vector<2x32xf32>
    %41 = arith.addf %34, %40 : vector<2x32xf32>
    %42 = math.tanh %41 : vector<2x32xf32>
    %cst_26 = arith.constant 1.000000e+00 : f32
    %43 = vector.broadcast %cst_26 : f32 to vector<2x32xf32>
    %44 = arith.subf %43, %29 : vector<2x32xf32>
    %45 = arith.mulf %44, %42 : vector<2x32xf32>
    %46 = arith.mulf %29, %8 : vector<2x32xf32>
    %47 = arith.addf %45, %46 : vector<2x32xf32>
    %c0_27 = arith.constant 0 : index
    %c0_28 = arith.constant 0 : index
    %c0_29 = arith.constant 0 : index
    %48 = vector.load %arg22[%c0_27, %c0_28, %c0_29] : memref<2x2x32xf32, #tpu.memory_space<vmem>>, vector<1x2x32xf32>
    %49 = vector.shape_cast %48 : vector<1x2x32xf32> to vector<2x32xf32>
    %50 = vector.shape_cast %47 : vector<2x32xf32> to vector<1x2x32xf32>
    tpu.vector_store %arg22[%c0_27, %c0_28, %c0_29], %50 {strides = array<i32>} : memref<2x2x32xf32, #tpu.memory_space<vmem>>, vector<1x2x32xf32>,
    %c1_30 = arith.constant 1 : index
    %c0_31 = arith.constant 0 : index
    %c0_32 = arith.constant 0 : index
    %51 = vector.load %arg2[%c1_30, %c0_31, %c0_32] : memref<2x2x32xf32, #tpu.memory_space<vmem>>, vector<1x2x32xf32>
    %52 = vector.shape_cast %51 : vector<1x2x32xf32> to vector<2x32xf32>
    %53 = tpu.concatenate %47, %52 in 1 : vector<2x32xf32>, vector<2x32xf32> -> vector<2x64xf32>
    %c0_33 = arith.constant 0 : index
    %c0_34 = arith.constant 0 : index
    %54 = vector.load %arg11[%c0_33, %c0_34] : memref<64x32xf32, #tpu.memory_space<vmem>>, vector<64x32xf32>
    %cst_35 = arith.constant dense<0.000000e+00> : vector<2x32xf32>
    %55 = tpu.matmul %53, %54, %cst_35 {dimension_numbers = #tpu.dot_dimension_numbers<[1], [0], [0], [1], [0, 0, 1, 1], [], []>, precision = #tpu.contract_precision<fp32>} : vector<2x64xf32>, vector<64x32xf32>, vector<2x32xf32> -> vector<2x32xf32>
    %c0_36 = arith.constant 0 : index
    %c0_37 = arith.constant 0 : index
    %56 = vector.load %arg15[%c0_36, %c0_37] : memref<1x32xf32, #tpu.memory_space<vmem>>, vector<1x32xf32>
    %57 = vector.broadcast %56 : vector<1x32xf32> to vector<2x32xf32>
    %58 = arith.addf %55, %57 : vector<2x32xf32>
    %59 = arith.negf %58 : vector<2x32xf32>
    %60 = math.exp %59 : vector<2x32xf32>
    %cst_38 = arith.constant 1.000000e+00 : f32
    %61 = vector.broadcast %cst_38 : f32 to vector<2x32xf32>
    %62 = arith.addf %61, %60 : vector<2x32xf32>
    %63 = arith.divf %61, %62 : vector<2x32xf32>
    %c0_39 = arith.constant 0 : index
    %c0_40 = arith.constant 0 : index
    %64 = vector.load %arg12[%c0_39, %c0_40] : memref<64x32xf32, #tpu.memory_space<vmem>>, vector<64x32xf32>
    %cst_41 = arith.constant dense<0.000000e+00> : vector<2x32xf32>
    %65 = tpu.matmul %53, %64, %cst_41 {dimension_numbers = #tpu.dot_dimension_numbers<[1], [0], [0], [1], [0, 0, 1, 1], [], []>, precision = #tpu.contract_precision<fp32>} : vector<2x64xf32>, vector<64x32xf32>, vector<2x32xf32> -> vector<2x32xf32>
    %c0_42 = arith.constant 0 : index
    %c0_43 = arith.constant 0 : index
    %66 = vector.load %arg16[%c0_42, %c0_43] : memref<1x32xf32, #tpu.memory_space<vmem>>, vector<1x32xf32>
    %67 = vector.broadcast %66 : vector<1x32xf32> to vector<2x32xf32>
    %68 = arith.addf %65, %67 : vector<2x32xf32>
    %69 = arith.negf %68 : vector<2x32xf32>
    %70 = math.exp %69 : vector<2x32xf32>
    %cst_44 = arith.constant 1.000000e+00 : f32
    %71 = vector.broadcast %cst_44 : f32 to vector<2x32xf32>
    %72 = arith.addf %71, %70 : vector<2x32xf32>
    %73 = arith.divf %71, %72 : vector<2x32xf32>
    %c0_45 = arith.constant 0 : index
    %c0_46 = arith.constant 0 : index
    %74 = vector.load %arg13[%c0_45, %c0_46] : memref<32x32xf32, #tpu.memory_space<vmem>>, vector<32x32xf32>
    %cst_47 = arith.constant dense<0.000000e+00> : vector<2x32xf32>
    %75 = tpu.matmul %47, %74, %cst_47 {dimension_numbers = #tpu.dot_dimension_numbers<[1], [0], [0], [1], [0, 0, 1, 1], [], []>, precision = #tpu.contract_precision<fp32>} : vector<2x32xf32>, vector<32x32xf32>, vector<2x32xf32> -> vector<2x32xf32>
    %c0_48 = arith.constant 0 : index
    %c0_49 = arith.constant 0 : index
    %76 = vector.load %arg17[%c0_48, %c0_49] : memref<1x32xf32, #tpu.memory_space<vmem>>, vector<1x32xf32>
    %77 = vector.broadcast %76 : vector<1x32xf32> to vector<2x32xf32>
    %78 = arith.addf %75, %77 : vector<2x32xf32>
    %c0_50 = arith.constant 0 : index
    %c0_51 = arith.constant 0 : index
    %79 = vector.load %arg14[%c0_50, %c0_51] : memref<32x32xf32, #tpu.memory_space<vmem>>, vector<32x32xf32>
    %cst_52 = arith.constant dense<0.000000e+00> : vector<2x32xf32>
    %80 = tpu.matmul %52, %79, %cst_52 {dimension_numbers = #tpu.dot_dimension_numbers<[1], [0], [0], [1], [0, 0, 1, 1], [], []>, precision = #tpu.contract_precision<fp32>} : vector<2x32xf32>, vector<32x32xf32>, vector<2x32xf32> -> vector<2x32xf32>
    %c0_53 = arith.constant 0 : index
    %c0_54 = arith.constant 0 : index
    %81 = vector.load %arg18[%c0_53, %c0_54] : memref<1x32xf32, #tpu.memory_space<vmem>>, vector<1x32xf32>
    %82 = vector.broadcast %81 : vector<1x32xf32> to vector<2x32xf32>
    %83 = arith.addf %80, %82 : vector<2x32xf32>
    %84 = arith.mulf %63, %83 : vector<2x32xf32>
    %85 = arith.addf %78, %84 : vector<2x32xf32>
    %86 = math.tanh %85 : vector<2x32xf32>
    %cst_55 = arith.constant 1.000000e+00 : f32
    %87 = vector.broadcast %cst_55 : f32 to vector<2x32xf32>
    %88 = arith.subf %87, %73 : vector<2x32xf32>
    %89 = arith.mulf %88, %86 : vector<2x32xf32>
    %90 = arith.mulf %73, %52 : vector<2x32xf32>
    %91 = arith.addf %89, %90 : vector<2x32xf32>
    %c1_56 = arith.constant 1 : index
    %c0_57 = arith.constant 0 : index
    %c0_58 = arith.constant 0 : index
    %92 = vector.load %arg22[%c1_56, %c0_57, %c0_58] : memref<2x2x32xf32, #tpu.memory_space<vmem>>, vector<1x2x32xf32>
    %93 = vector.shape_cast %92 : vector<1x2x32xf32> to vector<2x32xf32>
    %94 = vector.shape_cast %91 : vector<2x32xf32> to vector<1x2x32xf32>
    tpu.vector_store %arg22[%c1_56, %c0_57, %c0_58], %94 {strides = array<i32>} : memref<2x2x32xf32, #tpu.memory_space<vmem>>, vector<1x2x32xf32>,
    %c0_59 = arith.constant 0 : index
    %c0_60 = arith.constant 0 : index
    %95 = vector.load %arg19[%c0_59, %c0_60] : memref<32x32xf32, #tpu.memory_space<vmem>>, vector<32x32xf32>
    %cst_61 = arith.constant dense<0.000000e+00> : vector<2x32xf32>
    %96 = tpu.matmul %91, %95, %cst_61 {dimension_numbers = #tpu.dot_dimension_numbers<[1], [0], [0], [1], [0, 0, 1, 1], [], []>, precision = #tpu.contract_precision<fp32>} : vector<2x32xf32>, vector<32x32xf32>, vector<2x32xf32> -> vector<2x32xf32>
    %c0_62 = arith.constant 0 : index
    %c0_63 = arith.constant 0 : index
    %97 = vector.load %arg20[%c0_62, %c0_63] : memref<1x32xf32, #tpu.memory_space<vmem>>, vector<1x32xf32>
    %98 = vector.broadcast %97 : vector<1x32xf32> to vector<2x32xf32>
    %99 = arith.addf %96, %98 : vector<2x32xf32>
    %c0_64 = arith.constant 0 : index
    %c0_65 = arith.constant 0 : index
    %100 = vector.load %arg21[%c0_64, %c0_65] : memref<2x32xf32, #tpu.memory_space<vmem>>, vector<2x32xf32>
    tpu.vector_store %arg21[%c0_64, %c0_65], %99 {strides = array<i32>} : memref<2x32xf32, #tpu.memory_space<vmem>>, vector<2x32xf32>,
    return
  }
}

</mosaic_0001>

<bundles_post_ra>
// kernel: simple_decoder_forward.1
= control target key start
LH: loop header
LB: loop body
LE: loop exit
PB: predicated region body
PF: predicated region fallthrough
CT: control target
= control target key end

     0   :  { %s7688_s0 = inlined_call_operand.vmem [shape: s32[2], index: 0, kind: input, shape index: {}]   ;;  %s7689_s1 = inlined_call_operand.vmem [shape: f32[32,16], index: 1, kind: input, shape index: {}]   ;;  %s7690_s2 = inlined_call_operand.hbm [shape: f32[2,2,32], index: 2, kind: input, shape index: {}, may-alias: {2,22}]   ;;  %s7691_s3 = inlined_call_operand.vmem [shape: f32[48,32], index: 3, kind: input, shape index: {}]   ;;  %s7692_s4 = inlined_call_operand.vmem [shape: f32[48,32], index: 4, kind: input, shape index: {}]   ;;  %s7693_s5 = inlined_call_operand.vmem [shape: f32[16,32], index: 5, kind: input, shape index: {}]   ;;  %s7694_s6 = inlined_call_operand.vmem [shape: f32[32,32], index: 6, kind: input, shape index: {}]   ;;  %s7695_s7 = inlined_call_operand.vmem [shape: f32[1,32], index: 7, kind: input, shape index: {}]   ;;  %s7696_s8 = inlined_call_operand.vmem [shape: f32[1,32], index: 8, kind: input, shape index: {}]   ;;  %s7697_s9 = inlined_call_operand.vmem [shape: f32[1,32], index: 9, kind: input, shape index: {}]   ;;  %s7698_s10 = inlined_call_operand.vmem [shape: f32[1,32], index: 10, kind: input, shape index: {}]   ;;  %s7699_s11 = inlined_call_operand.vmem [shape: f32[64,32], index: 11, kind: input, shape index: {}]   ;;  %s7700_s12 = inlined_call_operand.vmem [shape: f32[64,32], index: 12, kind: input, shape index: {}]   ;;  %s7701_s13 = inlined_call_operand.vmem [shape: f32[32,32], index: 13, kind: input, shape index: {}]   ;;  %s7702_s14 = inlined_call_operand.vmem [shape: f32[32,32], index: 14, kind: input, shape index: {}]   ;;  %s7703_s15 = inlined_call_operand.vmem [shape: f32[1,32], index: 15, kind: input, shape index: {}]   ;;  %s7704_s16 = inlined_call_operand.vmem [shape: f32[1,32], index: 16, kind: input, shape index: {}]   ;;  %s7705_s17 = inlined_call_operand.vmem [shape: f32[1,32], index: 17, kind: input, shape index: {}]   ;;  %s7706_s18 = inlined_call_operand.vmem [shape: f32[1,32], index: 18, kind: input, shape index: {}]   ;;  %s7707_s19 = inlined_call_operand.vmem [shape: f32[32,32], index: 19, kind: input, shape index: {}]   ;;  %s7708_s20 = inlined_call_operand.vmem [shape: f32[1,32], index: 20, kind: input, shape index: {}]   ;;  %s7709_s21 = inlined_call_operand.hbm [shape: f32[2,32], index: 21, kind: output, shape index: {0}]   ;;  %s7710_s22 = inlined_call_operand.hbm [shape: f32[2,2,32], index: 22, kind: output, shape index: {1}, may-alias: {2,22}]  }
   0x1   :  { %7726 = sst [smem:[#allocation14_spill]] %s7688_s0 }
   0x2   :  { %7727 = sst [smem:[#allocation15_spill]] %s7689_s1 }
   0x3   :  { %7728 = sst [smem:[#allocation16_spill]] %s7690_s2 }
   0x4   :  { %7729 = sst [smem:[#allocation17_spill]] %s7691_s3 }
   0x5   :  { %7730 = sst [smem:[#allocation18_spill]] %s7692_s4 }
   0x6   :  { %7731 = sst [smem:[#allocation19_spill]] %s7693_s5 }
   0x7   :  { %7732 = sst [smem:[#allocation20_spill]] %s7694_s6 }
   0x8   :  { %28 = vsyncpa [#allocation5], 0 }
   0x9   :  { %29 = vsyncpa [#allocation3], 0 }
   0xa   :  { %30 = vsyncpa [#allocation4], 0 }
   0xb   :  { %31 = vsyncpa [#allocation9], 0  ;;  %s7733_s29 = sld [smem:[#allocation14_spill]] }
  0x11   :  { %s38_s30 = sshll.u32 %s7733_s29, 4  ;;  %s39_s30 = int_to_ptr.vmem [resolvable:$true] %s38_s30 }
  0x12   :  { %s6408_s4 = scalar_lea.vmem %s39_s30, 16  ;;  %p6413_p1 = scmp.lt.s32.totalorder %s39_s30, %s39_s30 }
  0x13   :  { %p6409_p0 = scmp.ne.s32.totalorder %s39_s30, %s6408_s4  ;;  %p6414_p2 = scmp.lt.s32.totalorder %s6408_s4, %s6408_s4 }
  0x15   :  { %p6415_p3 = por %p6414_p2, %p6413_p1 }
  0x17   :  { %p6416_p4 = pnand %p6415_p3, %p6409_p0 }
  0x19   :  { %6419 = shalt.err (!%p6416_p4)
}
  0x1a   :  { %s6494_s0 = smov [#allocation2]   ;;  %s6495_s23 = smov [#allocation6]  }
  0x1b   :  { %41 = dma.vmem_to_smem %s39_s30, 16, %s6494_s0, [#allocation5]  }
  0x1c   :  { %s49_s1 = sshll.u32 %s6495_s23, 4  ;;  %s7734_s6 = sld [smem:[#allocation16_spill]]  ;;  %s50_s1 = int_to_ptr.vmem [resolvable:$true] %s49_s1 }
  0x22   :  { %s6420_s25 = scalar_lea.hbm %s7734_s6, 64 }
  0x23   :  { %p6421_p5 = scmp.ne.s32.totalorder %s7734_s6, %s6420_s25  ;;  %p6424_p6 = scmp.lt.u32.totalorder %s6420_s25, %s7734_s6 }
  0x25   :  { %p6426_p7 = pnand %p6424_p6, %p6421_p5 }
  0x27   :  { %6429 = shalt.err (!%p6426_p7)
}
  0x28   :  { %s6430_s28 = scalar_lea.vmem %s50_s1, 64  ;;  %p6435_p9 = scmp.lt.s32.totalorder %s50_s1, %s50_s1 }
  0x29   :  { %p6431_p8 = scmp.ne.s32.totalorder %s50_s1, %s6430_s28  ;;  %p6436_p10 = scmp.lt.s32.totalorder %s6430_s28, %s6430_s28 }
  0x2b   :  { %p6437_p11 = por %p6436_p10, %p6435_p9 }
  0x2d   :  { %p6438_p12 = pnand %p6437_p11, %p6431_p8 }
  0x2f   :  { %6441 = shalt.err (!%p6438_p12)
}
  0x30   :  { %s6496_s29 = smov 32   ;;  %s6497_s30 = smov 2  }
  0x31   :  { %55 = dma.hbm_to_vmem [thread:$0]  %s7734_s6, 64, %s50_s1, [#allocation3], %s6496_s29, %s6496_s29, %s6497_s30  }
  0x32   :  { %6486 = dma.done.wait [#allocation5], 16  }
  0x33   :  { %6487 = vsyncadd [#allocation5], 4294967280 }
  0x34   :  { %6488 = dma.done.wait [#allocation3], 64  }
  0x35   :  { %6489 = vsyncadd [#allocation3], 4294967232 }
  0x36   :  { %98 = sfence }
  0x37   :  { %v6637_v0 = vld [vmem:[#allocation6] sm:$0x3]  ;;  %s6498_s23 = smov 16   ;;  %v7719_v1 = vmov 0.0|0.0   ;;  %s7735_s25 = sld [smem:[#allocation17_spill]]  ;;  %vm6500_vm0 = vmmov 0  }
  0x38   :  { %112 = vrot.lane.b32.xlu0 %v6637_v0, %s6498_s23  ;;  %5885 = vmatprep.subr.bf16.mxu0 %v7719_v1  ;;  %s7736_s27 = sld [smem:[#allocation18_spill]]  ;;  %v7717_v47 = vmov 0.0   ;;  %s99_s24 = sld [smem:[#allocation2]]  ;;  %vm108_vm1 = vcmask 1040384   ;;  %vm115_vm2 = vcmask 130048   ;;  %vm130_vm3 = vcmask 392192  }
  0x39   :  { %5939 = vmatprep.subr.bf16.mxu1 %v7719_v1  ;;  %5183 = vmatprep.mubr.msk.f32.mxu0 %vm6500_vm0, %v7717_v47  ;;  %s7737_s26 = sld [smem:[#allocation15_spill]]  ;;  %vm1663_vm4 = vcmask 261120   ;;  %s7739_s6 = sld [smem:[#allocation20_spill]]  ;;  %vm2158_vm5 = vcmask 254976   ;;  %vm2182_vm6 = vcmask 523264  }
  0x3a   :  { %5273 = vmatprep.mubr.msk.f32.mxu1 %vm6500_vm0, %v7717_v47 }
  0x3d   :  { %v117_v2 = vld [vmem:[%s7735_s25] sm:$0xff]  ;;  %v118_v3 = vld [vmem:[%s7735_s25 + $0x8] sm:$0xff]  ;;  %v119_v9 = vld [vmem:[%s7735_s25 + $0x10] sm:$0xff] }
  0x3e   :  { %v651_v4 = vld [vmem:[%s7736_s27] sm:$0xff]  ;;  %v135_v5 = vand.u32 4294901760, %v117_v2  ;;  %v138_v6 = vand.u32 4294901760, %v118_v3  ;;  %v652_v7 = vld [vmem:[%s7736_s27 + $0x8] sm:$0xff]  ;;  %v120_v10 = vld [vmem:[%s7735_s25 + $0x18] sm:$0xff]  ;;  %v141_v12 = vand.u32 4294901760, %v119_v9 }
  0x3f   :  { %v665_v8 = vand.u32 4294901760, %v651_v4  ;;  %v668_v11 = vand.u32 4294901760, %v652_v7  ;;  %v144_v13 = vand.u32 4294901760, %v120_v10  ;;  %v653_v14 = vld [vmem:[%s7736_s27 + $0x10] sm:$0xff]  ;;  %v654_v15 = vld [vmem:[%s7736_s27 + $0x18] sm:$0xff]  ;;  %v121_v20 = vld [vmem:[%s7735_s25 + $0x20] sm:$0xff]  ;;  %s100_s4 = scalar_lea.vmem %s7737_s26, %s99_s24 }
  0x40   :  { %v6666_v16 = vpack.c.bf16 %v138_v6, %v135_v5  ;;  %v6668_v17 = vsub.f32 %v117_v2, %v135_v5  ;;  %v6670_v18 = vsub.f32 %v118_v3, %v138_v6  ;;  %v122_v21 = vld [vmem:[%s7735_s25 + $0x28] sm:$0xff]  ;;  %v6687_v25 = vsub.f32 %v119_v9, %v141_v12  ;;  %v655_v29 = vld [vmem:[%s7736_s27 + $0x20] sm:$0xff]  ;;  %s7738_s25 = sld [smem:[#allocation19_spill]] }
  0x41   :  { %v6672_v19 = vsub.f32 %v651_v4, %v665_v8  ;;  %v6680_v22 = vpack.c.bf16 %v668_v11, %v665_v8  ;;  %v6682_v23 = vsub.f32 %v652_v7, %v668_v11  ;;  %v6684_v24 = vpack.c.bf16 %v144_v13, %v141_v12  ;;  %v656_v32 = vld [vmem:[%s7736_s27 + $0x28] sm:$0xff]  ;;  %s4827_s27 = sld [smem:[#allocation2 + $0x1]] }
  0x42   :  { %5887 = vmatpush3.bf16.msra.mxu0 %v6666_v16  ;;  %v6689_v26 = vsub.f32 %v120_v10, %v144_v13  ;;  %v671_v27 = vand.u32 4294901760, %v653_v14  ;;  %v674_v28 = vand.u32 4294901760, %v654_v15  ;;  %v147_v30 = vand.u32 4294901760, %v121_v20 }
  0x43   :  { %5941 = vmatpush3.bf16.msra.mxu1 %v6680_v22  ;;  %5888 = vmatprep.subr.bf16.mxu0 %v7719_v1  ;;  %v150_v31 = vand.u32 4294901760, %v122_v21  ;;  %v677_v38 = vand.u32 4294901760, %v655_v29  ;;  %v680_v40 = vand.u32 4294901760, %v656_v32  ;;  %v218_v41 = vand.u32 4294901760, %v6668_v17 }
  0x44   :  { %5942 = vmatprep.subr.bf16.mxu1 %v7719_v1  ;;  %v6700_v33 = vpack.c.bf16 %v674_v28, %v671_v27  ;;  %v6702_v34 = vsub.f32 %v653_v14, %v671_v27  ;;  %v6704_v35 = vsub.f32 %v654_v15, %v674_v28  ;;  %v6706_v36 = vsub.f32 %v121_v20, %v147_v30 }
  0x45   :  { %v6708_v37 = vsub.f32 %v122_v21, %v150_v31  ;;  %v6711_v39 = vpack.c.bf16 %v150_v31, %v147_v30  ;;  %v6716_v42 = vsub.f32 %v655_v29, %v677_v38  ;;  %v225_v43 = vand.u32 4294901760, %v6670_v18 }
  0x46   :  { %5890 = vmatpush3.bf16.msra.mxu0 %v6684_v24  ;;  %v748_v44 = vand.u32 4294901760, %v6672_v19  ;;  %v6721_v45 = vpack.c.bf16 %v680_v40, %v677_v38  ;;  %v6723_v46 = vsub.f32 %v656_v32, %v680_v40  ;;  %v219_v48 = vsub.f32 %v6668_v17, %v218_v41 }
  0x47   :  { %5944 = vmatpush3.bf16.msra.mxu1 %v6700_v33  ;;  %5891 = vmatprep.subr.bf16.mxu0 %v7719_v1  ;;  %v226_v49 = vsub.f32 %v6670_v18, %v225_v43  ;;  %v755_v51 = vand.u32 4294901760, %v6682_v23  ;;  %v232_v52 = vand.u32 4294901760, %v6687_v25  ;;  %v239_v54 = vand.u32 4294901760, %v6689_v26  ;;  %s103_s2 = scalar_lea.vmem %s7737_s26, %s4827_s27 }
  0x48   :  { %5945 = vmatprep.subr.bf16.mxu1 %v7719_v1  ;;  %v749_v50 = vsub.f32 %v6672_v19, %v748_v44  ;;  %v220_v53 = vand.u32 4294901760, %v219_v48  ;;  %v762_v55 = vand.u32 4294901760, %v6702_v34  ;;  %v769_v62 = vand.u32 4294901760, %v6704_v35 }
  0x49   :  { %v227_v56 = vand.u32 4294901760, %v226_v49  ;;  %v756_v58 = vsub.f32 %v6682_v23, %v755_v51  ;;  %v233_v59 = vsub.f32 %v6687_v25, %v232_v52  ;;  %v240_v60 = vsub.f32 %v6689_v26, %v239_v54 }
  0x4a   :  { %5893 = vmatpush3.bf16.msra.mxu0 %v6711_v39  ;;  %v750_v57 = vand.u32 4294901760, %v749_v50  ;;  %v763_v61 = vsub.f32 %v6702_v34, %v762_v55  ;;  %v246_v63 = vand.u32 4294901760, %v6706_v36  ;;  %v253_v5 = vand.u32 4294901760, %v6708_v37 }
  0x4b   :  { %5947 = vmatpush3.bf16.msra.mxu1 %v6721_v45  ;;  %5894 = vmatprep.subr.bf16.mxu0 %v7719_v1  ;;  %v5895_v2 = vpack.c.bf16 %v227_v56, %v220_v53  ;;  %v757_v3 = vand.u32 4294901760, %v756_v58  ;;  %v234_v4 = vand.u32 4294901760, %v233_v59  ;;  %v241_v6 = vand.u32 4294901760, %v240_v60  ;;  %v1182_v58 = vld [vmem:[%s7738_s25 + $0x8] sm:$0xff] }
  0x4c   :  { %5948 = vmatprep.subr.bf16.mxu1 %v7719_v1  ;;  %v764_v7 = vand.u32 4294901760, %v763_v61  ;;  %v770_v8 = vsub.f32 %v6704_v35, %v769_v62  ;;  %v247_v9 = vsub.f32 %v6706_v36, %v246_v63  ;;  %v254_v11 = vsub.f32 %v6708_v37, %v253_v5 }
  0x4d   :  { %v5949_v10 = vpack.c.bf16 %v757_v3, %v750_v57  ;;  %v776_v12 = vand.u32 4294901760, %v6716_v42  ;;  %v783_v13 = vand.u32 4294901760, %v6723_v46  ;;  %v5898_v14 = vpack.c.bf16 %v241_v6, %v234_v4  ;;  %v1181_v57 = vld [vmem:[%s7738_s25] sm:$0xff] }
  0x4e   :  { %v771_v15 = vand.u32 4294901760, %v770_v8  ;;  %v248_v20 = vand.u32 4294901760, %v247_v9  ;;  %v5904_v21 = vpack.c.bf16 %v6670_v18, %v6668_v17  ;;  %v255_v27 = vand.u32 4294901760, %v254_v11  ;;  %v1652_v9 = vld [vmem:[%s7739_s6] sm:$0xff] }
  0x4f   :  { %v777_v28 = vsub.f32 %v6716_v42, %v776_v12  ;;  %v784_v29 = vsub.f32 %v6723_v46, %v783_v13  ;;  %v5958_v30 = vpack.c.bf16 %v6682_v23, %v6672_v19  ;;  %v5907_v32 = vpack.c.bf16 %v6689_v26, %v6687_v25 }
  0x50   :  { %v5952_v31 = vpack.c.bf16 %v771_v15, %v764_v7  ;;  %v5961_v38 = vpack.c.bf16 %v6704_v35, %v6702_v34  ;;  %v5910_v40 = vpack.c.bf16 %v6708_v37, %v6706_v36  ;;  %v5901_v48 = vpack.c.bf16 %v255_v27, %v248_v20  ;;  %v104_v35 = vld [vmem:[%s103_s2] sm:$0x1]  ;;  %v1654_v15 = vld [vmem:[%s7739_s6 + $0x10] sm:$0xff] }
  0x51   :  { %v778_v17 = vand.u32 4294901760, %v777_v28  ;;  %v785_v18 = vand.u32 4294901760, %v784_v29  ;;  %v5964_v49 = vpack.c.bf16 %v6723_v46, %v6716_v42  ;;  %v6766_v53 = vpack.c.bf16 %v225_v43, %v218_v41  ;;  %v101_v37 = vld [vmem:[%s100_s4] sm:$0x1] }
  0x52   :  { %v6768_v19 = vpack.c.bf16 %v755_v51, %v748_v44  ;;  %v6770_v23 = vpack.c.bf16 %v239_v54, %v232_v52  ;;  %v6772_v25 = vpack.c.bf16 %v769_v62, %v762_v55  ;;  %v6774_v26 = vpack.c.bf16 %v253_v5, %v246_v63  ;;  %v6791_v52 = vld [vmem:[#allocation6 + $0x2] sm:$0x3] }
  0x53   :  { %v5955_v50 = vpack.c.bf16 %v785_v18, %v778_v17  ;;  %v6776_v34 = vpack.c.bf16 %v783_v13, %v776_v12  ;;  %v106_v36 = vrot.slane %v104_v35, 7  ;;  %2163 = vrot.lane.b32.xlu0 %v6791_v52, %s6496_s29  ;;  %v1194_v59 = vand.u32 4294901760, %v1181_v57 }
  0x54   :  { %v1197_v60 = vand.u32 4294901760, %v1182_v58  ;;  %v1667_v12 = vand.u32 4294901760, %v1652_v9  ;;  %v1673_v28 = vand.u32 4294901760, %v1654_v15 }
  0x55   :  { %v6784_v41 = vsel %vm108_vm1, %v101_v37, %v106_v36  ;;  %v1272_v62 = vsub.f32 %v1181_v57, %v1194_v59  ;;  %v2168_v57 = vld [vmem:[%s7699_s11 + $0x8] sm:$0xff] }
  0x56   :  { %v1191_v61 = vsel %vm115_vm2, %v6784_v41, 0  ;;  %v1279_v63 = vsub.f32 %v1182_v58, %v1197_v60  ;;  %v2729_v58 = vld [vmem:[%s7700_s12] sm:$0xff] }
  0x57   :  { %v1273_v3 = vand.u32 4294901760, %v1272_v62 }
  0x58   :  { %v1280_v4 = vand.u32 4294901760, %v1279_v63 }
  0x59   :  { %v1274_v6 = vsub.f32 %v1272_v62, %v1273_v3 }
  0x5a   :  { %v1281_v7 = vsub.f32 %v1279_v63, %v1280_v4 }
  0xaa   :  { %v113_v42 = vpop.permute.xlu0 %112 }
  0xab   :  { %v116_v43 = vsel %vm115_vm2, %v6784_v41, %v113_v42 }
  0xac   :  { %v132_v44 = vsel %vm130_vm3, %v116_v43, 0 }
  0xad   :  { %v6788_v46 = vand.u32 4294901760, %v132_v44 }
  0xaf   :  { %v206_v51 = vsub.f32 %v132_v44, %v6788_v46 }
  0xb1   :  { %v207_v54 = vand.u32 4294901760, %v206_v51 }
  0xb3   :  { %v208_v55 = vsub.f32 %v206_v51, %v207_v54 }
  0xb5   :  { %v209_v56 = vand.u32 4294901760, %v208_v55 }
  0xb7   :  { %5184 = vmatmul.mubr.f32.vlgmr.msra.gmra.mrb[0].mxu0 %v209_v56  ;;  %5274 = vmatmul.mubr.f32.vlgmr.msra.gmra.mrb[0].mxu1 %v209_v56  ;;  %v2167_v56 = vld [vmem:[%s7699_s11] sm:$0xff] }
  0xb8   :  { %5896 = vmatpush3.bf16.msra.mxu0 %v5895_v2  ;;  %5950 = vmatpush3.bf16.msra.mxu1 %v5949_v10  ;;  %v6853_v2 = vand.u32 4294901760, %v1191_v61  ;;  %v1653_v10 = vld [vmem:[%s7739_s6 + $0x8] sm:$0xff] }
  0xb9   :  { %5897 = vmatprep.subr.bf16.mxu0 %v7719_v1  ;;  %5951 = vmatprep.subr.bf16.mxu1 %v7719_v1  ;;  %v1670_v13 = vand.u32 4294901760, %v1653_v10 }
  0xba   :  { %5198 = vmatprep.mubr.msk.f32.mxu0 %vm6500_vm0, %v7717_v47  ;;  %5288 = vmatprep.mubr.msk.f32.mxu1 %vm6500_vm0, %v7717_v47  ;;  %v6860_v5 = vsub.f32 %v1191_v61, %v6853_v2  ;;  %v2730_v61 = vld [vmem:[%s7700_s12 + $0x8] sm:$0xff] }
  0xbb   :  { %v6904_v27 = vsub.f32 %v1653_v10, %v1670_v13  ;;  %v6012_v18 = vpack.c.bf16 %v1670_v13, %v1667_v12 }
  0xbc   :  { %5899 = vmatpush3.bf16.msra.mxu0 %v5898_v14  ;;  %5953 = vmatpush3.bf16.msra.mxu1 %v5952_v31  ;;  %v1262_v8 = vand.u32 4294901760, %v6860_v5  ;;  %v6006_v31 = vpack.c.bf16 %v1280_v4, %v1273_v3 }
  0xbd   :  { %5900 = vmatprep.subr.bf16.mxu0 %v7719_v1  ;;  %5954 = vmatprep.subr.bf16.mxu1 %v7719_v1 }
  0xbe   :  { %v1263_v11 = vsub.f32 %v6860_v5, %v1262_v8 }
  0xc0   :  { %5902 = vmatpush3.bf16.msra.mxu0 %v5901_v48  ;;  %5956 = vmatpush3.bf16.msra.mxu1 %v5955_v50  ;;  %v1755_v48 = vand.u32 4294901760, %v6904_v27 }
  0xc1   :  { %5903 = vmatprep.subr.bf16.mxu0 %v7719_v1  ;;  %5957 = vmatprep.subr.bf16.mxu1 %v7719_v1 }
  0xc2   :  { %v1756_v50 = vsub.f32 %v6904_v27, %v1755_v48 }
  0xc3   :  { %5199 = vmatmul.mubr.f32.vlgmr.msra.gmra.mrb[0].mxu0 %v6788_v46  ;;  %5289 = vmatmul.mubr.f32.vlgmr.msra.gmra.mrb[0].mxu1 %v6788_v46 }
  0xc4   :  { %5905 = vmatpush3.bf16.msra.mxu0 %v5904_v21  ;;  %5959 = vmatpush3.bf16.msra.mxu1 %v5958_v30  ;;  %v6902_v21 = vsub.f32 %v1652_v9, %v1667_v12 }
  0xc5   :  { %5906 = vmatprep.subr.bf16.mxu0 %v7719_v1  ;;  %5960 = vmatprep.subr.bf16.mxu1 %v7719_v1 }
  0xc6   :  { %5213 = vmatprep.mubr.msk.f32.mxu0 %vm6500_vm0, %v7717_v47  ;;  %5303 = vmatprep.mubr.msk.f32.mxu1 %vm6500_vm0, %v7717_v47 }
  0xc8   :  { %5908 = vmatpush3.bf16.msra.mxu0 %v5907_v32  ;;  %5962 = vmatpush3.bf16.msra.mxu1 %v5961_v38  ;;  %v6914_v32 = vsub.f32 %v1654_v15, %v1673_v28  ;;  %v2172_v15 = vld [vmem:[%s7699_s11 + $0x28] sm:$0xff] }
  0xc9   :  { %5909 = vmatprep.subr.bf16.mxu0 %v7719_v1  ;;  %5963 = vmatprep.subr.bf16.mxu1 %v7719_v1 }
  0xcc   :  { %5911 = vmatpush3.bf16.msra.mxu0 %v5910_v40  ;;  %5965 = vmatpush3.bf16.msra.mxu1 %v5964_v49  ;;  %v1748_v40 = vand.u32 4294901760, %v6902_v21 }
  0xcd   :  { %5912 = vmatprep.subr.bf16.mxu0 %v7719_v1  ;;  %5966 = vmatprep.subr.bf16.mxu1 %v7719_v1 }
  0xce   :  { %v1749_v49 = vsub.f32 %v6902_v21, %v1748_v40 }
  0xcf   :  { %5214 = vmatmul.mubr.f32.vlgmr.msra.gmra.mrb[0].mxu0 %v206_v51  ;;  %5304 = vmatmul.mubr.f32.vlgmr.msra.gmra.mrb[0].mxu1 %v206_v51 }
  0xd0   :  { %5914 = vmatpush3.bf16.msra.mxu0 %v6666_v16  ;;  %5968 = vmatpush3.bf16.msra.mxu1 %v6680_v22 }
  0xd1   :  { %5915 = vmatprep.subr.bf16.mxu0 %v7719_v1  ;;  %5969 = vmatprep.subr.bf16.mxu1 %v7719_v1 }
  0xd2   :  { %5228 = vmatprep.mubr.msk.f32.mxu0 %vm6500_vm0, %v7717_v47  ;;  %5318 = vmatprep.mubr.msk.f32.mxu1 %vm6500_vm0, %v7717_v47 }
  0xd4   :  { %5917 = vmatpush3.bf16.msra.mxu0 %v6684_v24  ;;  %5971 = vmatpush3.bf16.msra.mxu1 %v6700_v33 }
  0xd5   :  { %5918 = vmatprep.subr.bf16.mxu0 %v7719_v1  ;;  %5972 = vmatprep.subr.bf16.mxu1 %v7719_v1 }
  0xd8   :  { %5920 = vmatpush3.bf16.msra.mxu0 %v6711_v39  ;;  %5974 = vmatpush3.bf16.msra.mxu1 %v6721_v45 }
  0xd9   :  { %5921 = vmatprep.subr.bf16.mxu0 %v7719_v1  ;;  %5975 = vmatprep.subr.bf16.mxu1 %v7719_v1 }
  0xdb   :  { %5229 = vmatmul.mubr.f32.vlgmr.msra.gmra.mrb[0].mxu0 %v207_v54  ;;  %5319 = vmatmul.mubr.f32.vlgmr.msra.gmra.mrb[0].mxu1 %v207_v54  ;;  %v6036_v54 = vpack.c.bf16 %v1755_v48, %v1748_v40  ;;  %v2736_v48 = vld [vmem:[%s7700_s12 + $0x38] sm:$0xff] }
  0xdc   :  { %5923 = vmatpush3.bf16.msra.mxu0 %v6766_v53  ;;  %5977 = vmatpush3.bf16.msra.mxu1 %v6768_v19  ;;  %v1762_v53 = vand.u32 4294901760, %v6914_v32 }
  0xdd   :  { %5924 = vmatprep.subr.bf16.mxu0 %v7719_v1  ;;  %5978 = vmatprep.subr.bf16.mxu1 %v7719_v1 }
  0xde   :  { %5243 = vmatprep.mubr.msk.f32.mxu0 %vm6500_vm0, %v7717_v47  ;;  %5333 = vmatprep.mubr.msk.f32.mxu1 %vm6500_vm0, %v7717_v47  ;;  %v1763_v35 = vsub.f32 %v6914_v32, %v1762_v53 }
  0xe0   :  { %5926 = vmatpush3.bf16.msra.mxu0 %v6770_v23  ;;  %5980 = vmatpush3.bf16.msra.mxu1 %v6772_v25  ;;  %v1764_v42 = vand.u32 4294901760, %v1763_v35 }
  0xe1   :  { %5927 = vmatprep.subr.bf16.mxu0 %v7719_v1  ;;  %5981 = vmatprep.subr.bf16.mxu1 %v7719_v1 }
  0xe4   :  { %5929 = vmatpush3.bf16.msra.mxu0 %v6774_v26  ;;  %5983 = vmatpush3.bf16.msra.mxu1 %v6776_v34  ;;  %v1750_v26 = vand.u32 4294901760, %v1749_v49  ;;  %v1757_v34 = vand.u32 4294901760, %v1756_v50 }
  0xe5   :  { %5930 = vmatprep.subr.bf16.mxu0 %v7719_v1  ;;  %5984 = vmatprep.subr.bf16.mxu1 %v7719_v1 }
  0xe6   :  { %v6018_v41 = vpack.c.bf16 %v1757_v34, %v1750_v26 }
  0xe7   :  { %5244 = vmatmul.mubr.f32.vlgmr.msra.gmra.mrb[0].mxu0 %v6788_v46  ;;  %5334 = vmatmul.mubr.f32.vlgmr.msra.gmra.mrb[0].mxu1 %v6788_v46 }
  0xe8   :  { %5932 = vmatpush3.bf16.msra.mxu0 %v6666_v16  ;;  %5986 = vmatpush3.bf16.msra.mxu1 %v6680_v22  ;;  %v1275_v16 = vand.u32 4294901760, %v1274_v6  ;;  %v1282_v22 = vand.u32 4294901760, %v1281_v7 }
  0xe9   :  { %5933 = vmatprep.subr.bf16.mxu0 %v7719_v1  ;;  %5987 = vmatprep.subr.bf16.mxu1 %v7719_v1 }
  0xea   :  { %5258 = vmatprep.mubr.msk.f32.mxu0 %vm6500_vm0, %v7717_v47  ;;  %5348 = vmatprep.mubr.msk.f32.mxu1 %vm6500_vm0, %v7717_v47  ;;  %v5997_v14 = vpack.c.bf16 %v1282_v22, %v1275_v16  ;;  %v2170_v16 = vld [vmem:[%s7699_s11 + $0x18] sm:$0xff]  ;;  %v2731_v22 = vld [vmem:[%s7700_s12 + $0x10] sm:$0xff] }
  0xeb   :  { %v2196_v10 = vand.u32 4294901760, %v2170_v16 }
  0xec   :  { %5935 = vmatpush3.bf16.msra.mxu0 %v6684_v24  ;;  %5989 = vmatpush3.bf16.msra.mxu1 %v6700_v33  ;;  %v1664_v24 = vsel %vm1663_vm4, %v6637_v0, 0  ;;  %v5994_v33 = vpack.c.bf16 %v1197_v60, %v1194_v59  ;;  %v1655_v0 = vld [vmem:[%s7739_s6 + $0x18] sm:$0xff]  ;;  %v2187_v59 = vand.u32 4294901760, %v2167_v56  ;;  %v2190_v60 = vand.u32 4294901760, %v2168_v57 }
  0xed   :  { %5936 = vmatprep.subr.bf16.mxu0 %v7719_v1  ;;  %5990 = vmatprep.subr.bf16.mxu1 %v7719_v1  ;;  %v6896_v20 = vand.u32 4294901760, %v1664_v24  ;;  %v1676_v29 = vand.u32 4294901760, %v1655_v0  ;;  %v7059_v50 = vsub.f32 %v2170_v16, %v2196_v10 }
  0xee   :  { %v6993_v3 = vsub.f32 %v2167_v56, %v2187_v59  ;;  %v6995_v4 = vsub.f32 %v2168_v57, %v2190_v60 }
  0xef   :  { %v6911_v30 = vsub.f32 %v1664_v24, %v6896_v20  ;;  %v6916_v38 = vsub.f32 %v1655_v0, %v1676_v29  ;;  %v6015_v23 = vpack.c.bf16 %v1676_v29, %v1673_v28  ;;  %v2751_v24 = vand.u32 4294901760, %v2731_v22  ;;  %v2733_v0 = vld [vmem:[%s7700_s12 + $0x20] sm:$0xff] }
  0xf0   :  { %5938 = vmatpush3.bf16.msra.mxu0 %v6711_v39  ;;  %5992 = vmatpush3.bf16.msra.mxu1 %v6721_v45  ;;  %v1264_v39 = vand.u32 4294901760, %v1263_v11  ;;  %v6000_v45 = vpack.c.bf16 %v1279_v63, %v1272_v62  ;;  %v2745_v62 = vand.u32 4294901760, %v2729_v58  ;;  %v2748_v63 = vand.u32 4294901760, %v2730_v61  ;;  %v2732_v11 = vld [vmem:[%s7700_s12 + $0x18] sm:$0xff] }
  0xf1   :  { %5993 = vmatprep.subr.bf16.mxu0 %v7719_v1  ;;  %5996 = vmatprep.subr.bf16.mxu1 %v7719_v1  ;;  %v1737_v17 = vand.u32 4294901760, %v6911_v30  ;;  %v1769_v19 = vand.u32 4294901760, %v6916_v38  ;;  %v6027_v51 = vpack.c.bf16 %v6916_v38, %v6914_v32  ;;  %v2735_v32 = vld [vmem:[%s7700_s12 + $0x30] sm:$0xff] }
  0xf2   :  { %v6999_v6 = vpack.c.bf16 %v2748_v63, %v2745_v62  ;;  %v7001_v7 = vsub.f32 %v2730_v61, %v2748_v63 }
  0xf3   :  { %5259 = vmatmul.mubr.f32.vlgmr.msra.gmra.mrb[0].mxu0 %v6788_v46  ;;  %5349 = vmatmul.mubr.f32.vlgmr.msra.gmra.mrb[0].mxu1 %v6788_v46  ;;  %v1738_v25 = vsub.f32 %v6911_v30, %v1737_v17  ;;  %v1770_v36 = vsub.f32 %v6916_v38, %v1769_v19  ;;  %v6024_v46 = vpack.c.bf16 %v6904_v27, %v6902_v21  ;;  %v2757_v21 = vand.u32 4294901760, %v2733_v0 }
  0xf4   :  { %5995 = vmatpush3.bf16.msra.mxu0 %v5994_v33  ;;  %5355 = vmatprep.mubr.msk.f32.mxu0 %vm6500_vm0, %v7717_v47  ;;  %v6039_v55 = vpack.c.bf16 %v1769_v19, %v1762_v53  ;;  %v7061_v53 = vsub.f32 %v2731_v22, %v2751_v24 }
  0xf5   :  { %5998 = vmatpush3.bf16.msra.mxu1 %v5997_v14  ;;  %5999 = vmatprep.subr.bf16.mxu0 %v7719_v1  ;;  %v1739_v37 = vand.u32 4294901760, %v1738_v25  ;;  %v1771_v43 = vand.u32 4294901760, %v1770_v36  ;;  %v2171_v14 = vld [vmem:[%s7699_s11 + $0x20] sm:$0xff]  ;;  %v7070_v26 = vsub.f32 %v2733_v0, %v2757_v21 }
  0xf6   :  { %5362 = vmatprep.mubr.msk.f32.mxu1 %vm6500_vm0, %v7717_v47  ;;  %6002 = vmatprep.subr.bf16.mxu1 %v7719_v1  ;;  %v7725_v63 = vand.u32 4294901760, %v7061_v53 }
  0xf7   :  { %5356 = vmatmul.mubr.f32.vlgmr.msra.gmra.mrb[2].mxu0 %v1264_v39  ;;  %v6021_v44 = vpack.c.bf16 %v1771_v43, %v1764_v42  ;;  %v2202_v39 = vand.u32 4294901760, %v2172_v15 }
  0xf8   :  { %6001 = vmatpush3.bf16.msra.mxu0 %v6000_v45  ;;  %5363 = vmatmul.mubr.f32.vlgmr.msra.gmra.mrb[2].mxu1 %v6853_v2  ;;  %v2734_v45 = vld [vmem:[%s7700_s12 + $0x28] sm:$0xff] }
  0xf9   :  { %5369 = vmatprep.mubr.msk.f32.mxu0 %vm6500_vm0, %v7717_v47  ;;  %6004 = vmatpush3.bf16.msra.mxu1 %v5994_v33  ;;  %v2760_v27 = vand.u32 4294901760, %v2734_v45  ;;  %v7068_v25 = vsub.f32 %v2172_v15, %v2202_v39 }
  0xfa   :  { %6005 = vmatprep.subr.bf16.mxu0 %v7719_v1  ;;  %5376 = vmatprep.mubr.msk.f32.mxu1 %vm6500_vm0, %v7717_v47 }
  0xfb   :  { %5370 = vmatmul.mubr.f32.vlgmr.msra.gmra.mrb[4].mxu0 %v6860_v5  ;;  %6008 = vmatprep.subr.bf16.mxu1 %v7719_v1  ;;  %v6997_v5 = vsub.f32 %v2729_v58, %v2745_v62  ;;  %v7041_v29 = vpack.c.bf16 %v2760_v27, %v2757_v21  ;;  %v7072_v34 = vsub.f32 %v2734_v45, %v2760_v27 }
  0xfc   :  { %6007 = vmatpush3.bf16.msra.mxu0 %v6006_v31  ;;  %5377 = vmatmul.mubr.f32.vlgmr.msra.gmra.mrb[4].mxu1 %v1262_v8  ;;  %v2169_v8 = vld [vmem:[%s7699_s11 + $0x10] sm:$0xff]  ;;  %v2174_v31 = vld [vmem:[%s7699_s11 + $0x38] sm:$0xff] }
  0xfd   :  { %5383 = vmatprep.mubr.msk.f32.mxu0 %vm6500_vm0, %v7717_v47  ;;  %6010 = vmatpush3.bf16.msra.mxu1 %v5994_v33  ;;  %v2193_v9 = vand.u32 4294901760, %v2169_v8  ;;  %v2754_v33 = vand.u32 4294901760, %v2732_v11  ;;  %v2208_v40 = vand.u32 4294901760, %v2174_v31 }
  0xfe   :  { %6011 = vmatprep.subr.bf16.mxu0 %v7719_v1  ;;  %5390 = vmatprep.mubr.msk.f32.mxu1 %vm6500_vm0, %v7717_v47 }
  0xff   :  { %5384 = vmatmul.mubr.f32.vlgmr.msra.gmra.mrb[6].mxu0 %v6853_v2  ;;  %6047 = vmatprep.subr.bf16.mxu1 %v7719_v1  ;;  %v7019_v12 = vpack.c.bf16 %v2196_v10, %v2193_v9  ;;  %v7021_v13 = vpack.c.bf16 %v2754_v33, %v2751_v24  ;;  %v7057_v49 = vsub.f32 %v2169_v8, %v2193_v9 }
 0x100   :  { %6013 = vmatpush3.bf16.msra.mxu0 %v6012_v18  ;;  %5391 = vmatmul.mubr.f32.vlgmr.msra.gmra.mrb[6].mxu1 %v6853_v2  ;;  %v6991_v2 = vpack.c.bf16 %v2190_v60, %v2187_v59  ;;  %v7063_v19 = vsub.f32 %v2732_v11, %v2754_v33  ;;  %v2293_v60 = vand.u32 4294901760, %v7059_v50  ;;  %v2845_v33 = vsub.f32 %v7061_v53, %v7725_v63 }
 0x101   :  { %6014 = vmatprep.subr.bf16.mxu0 %v7719_v1  ;;  %5401 = vmatprep.mubr.msk.f32.mxu0 %vm6500_vm0, %v7717_v47  ;;  %v2286_v56 = vand.u32 4294901760, %v7057_v49 }
 0x102   :  { %5475 = vmatprep.mubr.msk.f32.mxu1 %vm6500_vm0, %v7717_v47  ;;  %6049 = vmatpush3.bf16.msra.mxu1 %v6991_v2  ;;  %v7724_v8 = vand.u32 4294901760, %v7063_v19  ;;  %v2294_v9 = vsub.f32 %v7059_v50, %v2293_v60  ;;  %v2846_v21 = vand.u32 4294901760, %v2845_v33 }
 0x103   :  { %6050 = vmatprep.subr.bf16.mxu1 %v7719_v1  ;;  %v2287_v62 = vsub.f32 %v7057_v49, %v2286_v56 }
 0x104   :  { %6016 = vmatpush3.bf16.msra.mxu0 %v6015_v23  ;;  %v2295_v0 = vand.u32 4294901760, %v2294_v9 }
 0x105   :  { %6017 = vmatprep.subr.bf16.mxu0 %v7719_v1  ;;  %v2288_v24 = vand.u32 4294901760, %v2287_v62 }
 0x106   :  { %6052 = vmatpush3.bf16.msra.mxu1 %v7019_v12 }
 0x107   :  { %5402 = vmatmul.mubr.f32.vlgmr.msra.gmra.mrb[8].mxu0 %v1739_v37  ;;  %6053 = vmatprep.subr.bf16.mxu1 %v7719_v1  ;;  %v7080_v37 = vsub.f32 %v2174_v31, %v2208_v40  ;;  %v7133_v31 = vpack.c.bf16 %v2295_v0, %v2288_v24 }
 0x108   :  { %6019 = vmatpush3.bf16.msra.mxu0 %v6018_v41  ;;  %5412 = vmatprep.mubr.msk.f32.mxu0 %vm6500_vm0, %v7717_v47  ;;  %v2766_v41 = vand.u32 4294901760, %v2736_v48 }
 0x109   :  { %6020 = vmatprep.subr.bf16.mxu0 %v7719_v1 }
 0x10c   :  { %6022 = vmatpush3.bf16.msra.mxu0 %v6021_v44  ;;  %v2279_v44 = vand.u32 4294901760, %v6995_v4 }
 0x10d   :  { %6023 = vmatprep.subr.bf16.mxu0 %v7719_v1 }
 0x10e   :  { %v2280_v58 = vsub.f32 %v6995_v4, %v2279_v44 }
 0x10f   :  { %5413 = vmatmul.mubr.f32.vlgmr.msra.gmra.mrb[8].mxu0 %v6896_v20 }
 0x110   :  { %6025 = vmatpush3.bf16.msra.mxu0 %v6024_v46  ;;  %5423 = vmatprep.mubr.msk.f32.mxu0 %vm6500_vm0, %v7717_v47  ;;  %v2830_v46 = vand.u32 4294901760, %v6997_v5  ;;  %v2281_v16 = vand.u32 4294901760, %v2280_v58 }
 0x111   :  { %6026 = vmatprep.subr.bf16.mxu0 %v7719_v1 }
 0x112   :  { %v2831_v59 = vsub.f32 %v6997_v5, %v2830_v46 }
 0x114   :  { %6028 = vmatpush3.bf16.msra.mxu0 %v6027_v51  ;;  %v2832_v22 = vand.u32 4294901760, %v2831_v59 }
 0x115   :  { %6029 = vmatprep.subr.bf16.mxu0 %v7719_v1 }
 0x117   :  { %5424 = vmatmul.mubr.f32.vlgmr.msra.gmra.mrb[8].mxu0 %v6911_v30  ;;  %v2173_v30 = vld [vmem:[%s7699_s11 + $0x30] sm:$0xff] }
 0x118   :  { %6031 = vmatpush3.bf16.msra.mxu0 %v6012_v18  ;;  %5434 = vmatprep.mubr.msk.f32.mxu0 %vm6500_vm0, %v7717_v47  ;;  %v2205_v38 = vand.u32 4294901760, %v2173_v30 }
 0x119   :  { %6032 = vmatprep.subr.bf16.mxu0 %v7719_v1 }
 0x11a   :  { %v7076_v35 = vpack.c.bf16 %v2208_v40, %v2205_v38  ;;  %v7078_v36 = vsub.f32 %v2173_v30, %v2205_v38  ;;  %v7721_v30 = vand.u32 4294901760, %v7070_v26  ;;  %v2865_v40 = vand.u32 4294901760, %v7072_v34 }
 0x11c   :  { %6034 = vmatpush3.bf16.msra.mxu0 %v6015_v23  ;;  %v2866_v58 = vsub.f32 %v7072_v34, %v2865_v40 }
 0x11d   :  { %6035 = vmatprep.subr.bf16.mxu0 %v7719_v1 }
 0x11f   :  { %5435 = vmatmul.mubr.f32.vlgmr.msra.gmra.mrb[8].mxu0 %v1737_v17  ;;  %v2763_v17 = vand.u32 4294901760, %v2735_v32 }
 0x120   :  { %6037 = vmatpush3.bf16.msra.mxu0 %v6036_v54  ;;  %5445 = vmatprep.mubr.msk.f32.mxu0 %vm6500_vm0, %v7717_v47  ;;  %v7092_v54 = vsub.f32 %v2736_v48, %v2766_v41 }
 0x121   :  { %6038 = vmatprep.subr.bf16.mxu0 %v7719_v1  ;;  %v7082_v42 = vsub.f32 %v2735_v32, %v2763_v17  ;;  %v7090_v51 = vpack.c.bf16 %v2766_v41, %v2763_v17  ;;  %v2859_v17 = vsub.f32 %v7070_v26, %v7721_v30  ;;  %v2314_v41 = vand.u32 4294901760, %v7078_v36 }
 0x123   :  { %v2872_v59 = vand.u32 4294901760, %v7082_v42  ;;  %v2860_v62 = vand.u32 4294901760, %v2859_v17 }
 0x124   :  { %6040 = vmatpush3.bf16.msra.mxu0 %v6039_v55  ;;  %v2837_v55 = vand.u32 4294901760, %v7001_v7 }
 0x125   :  { %6041 = vmatprep.subr.bf16.mxu0 %v7719_v1  ;;  %v2873_v24 = vsub.f32 %v7082_v42, %v2872_v59 }
 0x126   :  { %v2838_v61 = vsub.f32 %v7001_v7, %v2837_v55 }
 0x127   :  { %5446 = vmatmul.mubr.f32.vlgmr.msra.gmra.mrb[8].mxu0 %v6896_v20 }
 0x128   :  { %6043 = vmatpush3.bf16.msra.mxu0 %v6012_v18  ;;  %5456 = vmatprep.mubr.msk.f32.mxu0 %vm6500_vm0, %v7717_v47  ;;  %v2272_v18 = vand.u32 4294901760, %v6993_v3  ;;  %v2839_v11 = vand.u32 4294901760, %v2838_v61  ;;  %v2879_v61 = vand.u32 4294901760, %v7092_v54 }
 0x129   :  { %6044 = vmatprep.subr.bf16.mxu0 %v7719_v1 }
 0x12a   :  { %v2273_v43 = vsub.f32 %v6993_v3, %v2272_v18  ;;  %v7130_v45 = vpack.c.bf16 %v2839_v11, %v2832_v22  ;;  %v2867_v11 = vand.u32 4294901760, %v2866_v58  ;;  %v2880_v33 = vsub.f32 %v7092_v54, %v2879_v61 }
 0x12b   :  { %v7184_v63 = vpack.c.bf16 %v2279_v44, %v2272_v18 }
 0x12c   :  { %6046 = vmatpush3.bf16.msra.mxu0 %v6015_v23  ;;  %v2274_v57 = vand.u32 4294901760, %v2273_v43  ;;  %v2321_v43 = vand.u32 4294901760, %v7080_v37 }
 0x12d   :  { %6119 = vmatprep.subr.bf16.mxu0 %v7719_v1 }
 0x12e   :  { %v7124_v15 = vpack.c.bf16 %v2281_v16, %v2274_v57  ;;  %v2315_v16 = vsub.f32 %v7078_v36, %v2314_v41  ;;  %v2322_v22 = vsub.f32 %v7080_v37, %v2321_v43 }
 0x12f   :  { %5457 = vmatmul.mubr.f32.vlgmr.msra.gmra.mrb[8].mxu0 %v6896_v20  ;;  %v2199_v20 = vand.u32 4294901760, %v2171_v14 }
 0x130   :  { %5589 = vmatprep.mubr.msk.f32.mxu0 %vm6500_vm0, %v7717_v47  ;;  %6121 = vmatpush3.bf16.msra.mxu0 %v6999_v6  ;;  %v2323_v0 = vand.u32 4294901760, %v2322_v22 }
 0x131   :  { %6122 = vmatprep.subr.bf16.mxu0 %v7719_v1  ;;  %v7039_v28 = vpack.c.bf16 %v2202_v39, %v2199_v20  ;;  %v7066_v23 = vsub.f32 %v2171_v14, %v2199_v20  ;;  %v2852_v14 = vsub.f32 %v7063_v19, %v7724_v8  ;;  %v7722_v39 = vand.u32 4294901760, %v7068_v25 }
 0x133   :  { %6055 = vmatpush3.bf16.msra.mxu1 %v7039_v28  ;;  %v7723_v10 = vand.u32 4294901760, %v7066_v23  ;;  %v2853_v27 = vand.u32 4294901760, %v2852_v14  ;;  %v2308_v38 = vsub.f32 %v7068_v25, %v7722_v39  ;;  %v2316_v14 = vand.u32 4294901760, %v2315_v16 }
 0x134   :  { %6124 = vmatpush3.bf16.msra.mxu0 %v7021_v13  ;;  %6056 = vmatprep.subr.bf16.mxu1 %v7719_v1  ;;  %v7742_v44 = vand.u32 4294901760, %v7066_v23 }
 0x135   :  { %6125 = vmatprep.subr.bf16.mxu0 %v7719_v1  ;;  %v2301_v20 = vsub.f32 %v7066_v23, %v7723_v10  ;;  %v7139_v48 = vpack.c.bf16 %v2853_v27, %v2846_v21  ;;  %v2309_v57 = vand.u32 4294901760, %v2308_v38  ;;  %v2874_v21 = vand.u32 4294901760, %v2873_v24 }
 0x136   :  { %v2881_v27 = vand.u32 4294901760, %v2880_v33  ;;  %v7157_v38 = vpack.c.bf16 %v2323_v0, %v2316_v14 }
 0x137   :  { %6058 = vmatpush3.bf16.msra.mxu1 %v7076_v35  ;;  %v2302_v32 = vand.u32 4294901760, %v2301_v20  ;;  %v7155_v20 = vpack.c.bf16 %v2867_v11, %v2860_v62 }
 0x138   :  { %6127 = vmatpush3.bf16.msra.mxu0 %v7041_v29  ;;  %6059 = vmatprep.subr.bf16.mxu1 %v7719_v1  ;;  %v7159_v17 = vpack.c.bf16 %v2881_v27, %v2874_v21  ;;  %v4832_v21 = vld [vmem:[%s7697_s9] ss:$0 sm:$0xff] }
 0x139   :  { %6128 = vmatprep.subr.bf16.mxu0 %v7719_v1  ;;  %v7151_v9 = vpack.c.bf16 %v2309_v57, %v2302_v32 }
 0x13c   :  { %6130 = vmatpush3.bf16.msra.mxu0 %v7090_v51 }
 0x13d   :  { %6131 = vmatprep.subr.bf16.mxu0 %v7719_v1 }
 0x1c6   :  { %v641_v24 = vpop.f32.mrb[0].mxu0  ;;  %v1171_v33 = vpop.f32.mrb[0].mxu1 }
 0x1c7   :  { %v5260_v14 = vpop.f32.mrb[1].mxu0  ;;  %v5350_v0 = vpop.f32.mrb[1].mxu1 }
 0x1ca   :  { %v1266_v27 = vpop.f32.mrb[2].mxu0 }
 0x1cb   :  { %v1267_v58 = vadd.f32 %v4832_v21, %v1266_v27  ;;  %v5357_v62 = vpop.f32.mrb[3].mxu0  ;;  %v1347_v57 = vpop.f32.mrb[2].mxu1 }
 0x1cc   :  { %v5364_v32 = vpop.f32.mrb[3].mxu1 }
 0x1cd   :  { %v1348_v16 = vadd.f32 %v1347_v57, %v1267_v58  ;;  %v7190_v32 = vpack.c.bf16 %v2837_v55, %v2830_v46  ;;  %v7744_v55 = vand.u32 4294901760, %v7070_v26  ;;  %v7219_v58 = vpack.c.bf16 %v2879_v61, %v2872_v59 }
 0x1ce   :  { %v1423_v47 = vpop.f32.mrb[4].mxu0 }
 0x1cf   :  { %v1424_v1 = vadd.f32 %v1423_v47, %v1348_v16  ;;  %v5371_v22 = vpop.f32.mrb[5].mxu0  ;;  %v1498_v30 = vpop.f32.mrb[4].mxu1 }
 0x1d0   :  { %v5378_v39 = vpop.f32.mrb[5].mxu1  ;;  %v4830_v22 = vld [vmem:[%s7696_s8] ss:$0 sm:$0xff] }
 0x1d1   :  { %v1499_v11 = vadd.f32 %v1498_v30, %v1424_v1  ;;  %v7196_v1 = vpack.c.bf16 %v2293_v60, %v2286_v56  ;;  %v7741_v39 = vand.u32 4294901760, %v7063_v19  ;;  %v7743_v30 = vand.u32 4294901760, %v7068_v25  ;;  %v4828_v56 = vld [vmem:[%s7695_s7] ss:$0 sm:$0xff] }
 0x1d2   :  { %v1575_v10 = vpop.f32.mrb[6].mxu0  ;;  %v7217_v60 = vpack.c.bf16 %v2321_v43, %v2314_v41  ;;  %v6299_v62 = vadd.f32 %v4828_v56, %v641_v24  ;;  %v4833_v41 = vld [vmem:[%s7698_s10] ss:$0 sm:$0xff] }
 0x1d3   :  { %v1576_v8 = vadd.f32 %v1575_v10, %v1499_v11  ;;  %v5385_v14 = vpop.f32.mrb[7].mxu0  ;;  %v1648_v0 = vpop.f32.mrb[6].mxu1  ;;  %v7740_v10 = vand.u32 4294901760, %v7061_v53  ;;  %v7208_v46 = vpack.c.bf16 %v7743_v30, %v7742_v44  ;;  %v6300_v11 = vadd.f32 %v4830_v22, %v1171_v33 }
 0x1d4   :  { %v5392_v47 = vpop.f32.mrb[7].mxu1  ;;  %v4829_v16 = vmul.f32 -1.442695, %v6299_v62  ;;  %v2164_v62 = vpop.permute.xlu0 %2163 }
 0x1d5   :  { %v1649_v57 = vadd.f32 %v1648_v0, %v1576_v8  ;;  %v7202_v18 = vpack.c.bf16 %v7741_v39, %v7740_v10  ;;  %v7212_v8 = vpack.c.bf16 %v2865_v40, %v7744_v55  ;;  %v4831_v21 = vmul.f32 -1.442695, %v6300_v11  ;;  %v6406_v55 = vld [vmem:[#allocation6] sm:$0x3] }
 0x1d6   :  { %6386 = vpow2.f32 %v4829_v16 }
 0x1d7   :  { %6388 = vpow2.f32 %v4831_v21 }
 0x1e0   :  { %v6387_v27 = vpop.eup %6386 }
 0x1e1   :  { %v648_v40 = vadd.f32 1.0, %v6387_v27  ;;  %v6389_v14 = vpop.eup %6388 }
 0x1e2   :  { %v1178_v43 = vadd.f32 1.0, %v6389_v14 }
 0x1e3   :  { %6390 = vrcp.f32 %v648_v40 }
 0x1e4   :  { %6392 = vrcp.f32 %v1178_v43  ;;  %v7746_v43 = vmov 0.0  }
 0x1ed   :  { %v6391_v0 = vpop.eup %6390 }
 0x1ee   :  { %v6393_v33 = vpop.eup %6392 }
 0x1ef   :  { %v2154_v39 = vsub.f32 1.0, %v6393_v33  ;;  %v2156_v56 = vmul.f32 %v6406_v55, %v6393_v33 }
 0x202   :  { %v2147_v59 = vpop.f32.mrb[8].mxu0 }
 0x203   :  { %v6301_v61 = vadd.f32 %v4833_v41, %v2147_v59  ;;  %v5458_v24 = vpop.f32.mrb[9].mxu0  ;;  %v7745_v41 = vmov 0.0|0.0  }
 0x205   :  { %v2151_v47 = vmul.f32 %v6391_v0, %v6301_v61 }
 0x207   :  { %v2152_v10 = vadd.f32 %v2151_v47, %v1649_v57 }
 0x209   :  { %6394 = vtanh.f32 %v2152_v10 }
 0x213   :  { %v6395_v44 = vpop.eup %6394 }
 0x214   :  { %v2155_v30 = vmul.f32 %v6395_v44, %v2154_v39 }
 0x216   :  { %v7227_v16 = vadd.f32 %v2156_v56, %v2155_v30 }
 0x218   :  { %v2166_v22 = vsel %vm1663_vm4, %v7227_v16, %v2164_v62  ;;  %2159 = vst.msk [vmem:[#allocation8] sm:$0x3] %vm2158_vm5, %v7227_v16 }
 0x219   :  { %v2184_v11 = vsel %vm2182_vm6, %v2166_v22, 0 }
 0x21a   :  { %v7233_v57 = vand.u32 4294901760, %v2184_v11 }
 0x21c   :  { %v2260_v21 = vsub.f32 %v2184_v11, %v7233_v57 }
 0x21e   :  { %v7236_v27 = vand.u32 4294901760, %v2260_v21 }
 0x220   :  { %v2262_v40 = vsub.f32 %v2260_v21, %v7236_v27 }
 0x222   :  { %v2263_v14 = vand.u32 4294901760, %v2262_v40 }
 0x224   :  { %5476 = vmatmul.mubr.f32.vlgmr.msra.gmra.mrb[8].mxu1 %v2263_v14  ;;  %5590 = vmatmul.mubr.f32.vlgmr.msra.gmra.mrb[10].mxu0 %v2263_v14 }
 0x225   :  { %6061 = vmatpush3.bf16.msra.mxu1 %v7124_v15  ;;  %6133 = vmatpush3.bf16.msra.mxu0 %v7130_v45  ;;  %v7747_v15 = vpack.c.bf16 %v6995_v4, %v6993_v3  ;;  %v7748_v45 = vpack.c.bf16 %v7001_v7, %v6997_v5  ;;  %v7750_v3 = vpack.c.bf16 %v7063_v19, %v7061_v53  ;;  %v3288_v53 = vld [vmem:[%s7701_s13 + $0x8] sm:$0xff]  ;;  %v3786_v19 = vld [vmem:[%s7702_s14] sm:$0xff] }
 0x226   :  { %6062 = vmatprep.subr.bf16.mxu1 %v7745_v41  ;;  %6134 = vmatprep.subr.bf16.mxu0 %v7745_v41  ;;  %v7751_v4 = vpack.c.bf16 %v7068_v25, %v7066_v23  ;;  %v7752_v5 = vpack.c.bf16 %v7072_v34, %v7070_v26  ;;  %v7753_v7 = vpack.c.bf16 %v7080_v37, %v7078_v36  ;;  %v3787_v23 = vld [vmem:[%s7702_s14 + $0x8] sm:$0xff]  ;;  %v3797_v26 = vsel %vm1663_vm4, %v6791_v52, 0  ;;  %v3290_v52 = vld [vmem:[%s7701_s13 + $0x18] sm:$0xff] }
 0x227   :  { %5494 = vmatprep.mubr.msk.f32.mxu1 %vm6500_vm0, %v7746_v43  ;;  %5608 = vmatprep.mubr.msk.f32.mxu0 %vm6500_vm0, %v7746_v43  ;;  %v3305_v34 = vand.u32 4294901760, %v3288_v53  ;;  %v3800_v36 = vand.u32 4294901760, %v3786_v19  ;;  %v3803_v37 = vand.u32 4294901760, %v3787_v23 }
 0x229   :  { %6064 = vmatpush3.bf16.msra.mxu1 %v7133_v31  ;;  %6136 = vmatpush3.bf16.msra.mxu0 %v7139_v48  ;;  %v7749_v31 = vpack.c.bf16 %v7059_v50, %v7057_v49  ;;  %v7754_v49 = vpack.c.bf16 %v7092_v54, %v7082_v42  ;;  %v3287_v50 = vld [vmem:[%s7701_s13] sm:$0xff]  ;;  %v3289_v42 = vld [vmem:[%s7701_s13 + $0x10] sm:$0xff]  ;;  %v7433_v55 = vpack.c.bf16 %v3803_v37, %v3800_v36 }
 0x22a   :  { %6065 = vmatprep.subr.bf16.mxu1 %v7745_v41  ;;  %6137 = vmatprep.subr.bf16.mxu0 %v7745_v41  ;;  %v3302_v25 = vand.u32 4294901760, %v3287_v50  ;;  %v3788_v54 = vld [vmem:[%s7702_s14 + $0x10] sm:$0xff] }
 0x22c   :  { %v7379_v48 = vsub.f32 %v3287_v50, %v3302_v25  ;;  %v7416_v33 = vpack.c.bf16 %v3305_v34, %v3302_v25 }
 0x22d   :  { %6067 = vmatpush3.bf16.msra.mxu1 %v7151_v9  ;;  %6139 = vmatpush3.bf16.msra.mxu0 %v7155_v20  ;;  %v7381_v9 = vsub.f32 %v3288_v53, %v3305_v34  ;;  %v7383_v20 = vsub.f32 %v3786_v19, %v3800_v36 }
 0x22e   :  { %6068 = vmatprep.subr.bf16.mxu1 %v7745_v41  ;;  %6140 = vmatprep.subr.bf16.mxu0 %v7745_v41 }
 0x22f   :  { %v6204_v34 = vpack.c.bf16 %v7381_v9, %v7379_v48 }
 0x231   :  { %6070 = vmatpush3.bf16.msra.mxu1 %v7157_v38  ;;  %6142 = vmatpush3.bf16.msra.mxu0 %v7159_v17  ;;  %v7385_v38 = vsub.f32 %v3787_v23, %v3803_v37  ;;  %v3308_v17 = vand.u32 4294901760, %v3289_v42 }
 0x232   :  { %6071 = vmatprep.subr.bf16.mxu1 %v7745_v41  ;;  %6143 = vmatprep.subr.bf16.mxu0 %v7745_v41 }
 0x233   :  { %v3888_v59 = vand.u32 4294901760, %v7385_v38  ;;  %v6240_v36 = vpack.c.bf16 %v7385_v38, %v7383_v20 }
 0x234   :  { %5495 = vmatmul.mubr.f32.vlgmr.msra.gmra.mrb[8].mxu1 %v7233_v57  ;;  %5609 = vmatmul.mubr.f32.vlgmr.msra.gmra.mrb[10].mxu0 %v7233_v57 }
 0x235   :  { %6073 = vmatpush3.bf16.msra.mxu1 %v7747_v15  ;;  %6145 = vmatpush3.bf16.msra.mxu0 %v7748_v45  ;;  %v3889_v44 = vsub.f32 %v7385_v38, %v3888_v59 }
 0x236   :  { %6074 = vmatprep.subr.bf16.mxu1 %v7745_v41  ;;  %6146 = vmatprep.subr.bf16.mxu0 %v7745_v41 }
 0x237   :  { %5513 = vmatprep.mubr.msk.f32.mxu1 %vm6500_vm0, %v7746_v43  ;;  %5627 = vmatprep.mubr.msk.f32.mxu0 %vm6500_vm0, %v7746_v43  ;;  %v3890_v14 = vand.u32 4294901760, %v3889_v44 }
 0x239   :  { %6076 = vmatpush3.bf16.msra.mxu1 %v7749_v31  ;;  %6148 = vmatpush3.bf16.msra.mxu0 %v7750_v3 }
 0x23a   :  { %6077 = vmatprep.subr.bf16.mxu1 %v7745_v41  ;;  %6149 = vmatprep.subr.bf16.mxu0 %v7745_v41 }
 0x23d   :  { %6079 = vmatpush3.bf16.msra.mxu1 %v7751_v4  ;;  %6151 = vmatpush3.bf16.msra.mxu0 %v7752_v5 }
 0x23e   :  { %6080 = vmatprep.subr.bf16.mxu1 %v7745_v41  ;;  %6152 = vmatprep.subr.bf16.mxu0 %v7745_v41 }
 0x241   :  { %6082 = vmatpush3.bf16.msra.mxu1 %v7753_v7  ;;  %6154 = vmatpush3.bf16.msra.mxu0 %v7754_v49 }
 0x242   :  { %6083 = vmatprep.subr.bf16.mxu1 %v7745_v41  ;;  %6155 = vmatprep.subr.bf16.mxu0 %v7745_v41 }
 0x244   :  { %5514 = vmatmul.mubr.f32.vlgmr.msra.gmra.mrb[8].mxu1 %v2260_v21  ;;  %5628 = vmatmul.mubr.f32.vlgmr.msra.gmra.mrb[10].mxu0 %v2260_v21 }
 0x245   :  { %6085 = vmatpush3.bf16.msra.mxu1 %v6991_v2  ;;  %6157 = vmatpush3.bf16.msra.mxu0 %v6999_v6 }
 0x246   :  { %6086 = vmatprep.subr.bf16.mxu1 %v7745_v41  ;;  %6158 = vmatprep.subr.bf16.mxu0 %v7745_v41 }
 0x247   :  { %5532 = vmatprep.mubr.msk.f32.mxu1 %vm6500_vm0, %v7746_v43  ;;  %5646 = vmatprep.mubr.msk.f32.mxu0 %vm6500_vm0, %v7746_v43 }
 0x249   :  { %6088 = vmatpush3.bf16.msra.mxu1 %v7019_v12  ;;  %6160 = vmatpush3.bf16.msra.mxu0 %v7021_v13 }
 0x24a   :  { %6089 = vmatprep.subr.bf16.mxu1 %v7745_v41  ;;  %6161 = vmatprep.subr.bf16.mxu0 %v7745_v41 }
 0x24d   :  { %6091 = vmatpush3.bf16.msra.mxu1 %v7039_v28  ;;  %6163 = vmatpush3.bf16.msra.mxu0 %v7041_v29 }
 0x24e   :  { %6092 = vmatprep.subr.bf16.mxu1 %v7745_v41  ;;  %6164 = vmatprep.subr.bf16.mxu0 %v7745_v41 }
 0x251   :  { %6094 = vmatpush3.bf16.msra.mxu1 %v7076_v35  ;;  %6166 = vmatpush3.bf16.msra.mxu0 %v7090_v51 }
 0x252   :  { %6095 = vmatprep.subr.bf16.mxu1 %v7745_v41  ;;  %6167 = vmatprep.subr.bf16.mxu0 %v7745_v41 }
 0x254   :  { %5533 = vmatmul.mubr.f32.vlgmr.msra.gmra.mrb[8].mxu1 %v7236_v27  ;;  %5647 = vmatmul.mubr.f32.vlgmr.msra.gmra.mrb[10].mxu0 %v7236_v27 }
 0x255   :  { %6097 = vmatpush3.bf16.msra.mxu1 %v7184_v63  ;;  %6169 = vmatpush3.bf16.msra.mxu0 %v7190_v32  ;;  %v3299_v63 = vsel %vm1663_vm4, %v7227_v16, 0  ;;  %v3311_v32 = vand.u32 4294901760, %v3290_v52 }
 0x256   :  { %6098 = vmatprep.subr.bf16.mxu1 %v7745_v41  ;;  %6170 = vmatprep.subr.bf16.mxu0 %v7745_v41 }
 0x257   :  { %5551 = vmatprep.mubr.msk.f32.mxu1 %vm6500_vm0, %v7746_v43  ;;  %5665 = vmatprep.mubr.msk.f32.mxu0 %vm6500_vm0, %v7746_v43  ;;  %v7404_v61 = vsub.f32 %v3290_v52, %v3311_v32  ;;  %v7441_v11 = vpack.c.bf16 %v3311_v32, %v3308_v17 }
 0x259   :  { %6100 = vmatpush3.bf16.msra.mxu1 %v7196_v1  ;;  %6172 = vmatpush3.bf16.msra.mxu0 %v7202_v18  ;;  %v3806_v1 = vand.u32 4294901760, %v3788_v54  ;;  %v3404_v56 = vand.u32 4294901760, %v7404_v61 }
 0x25a   :  { %6101 = vmatprep.subr.bf16.mxu1 %v7745_v41  ;;  %6173 = vmatprep.subr.bf16.mxu0 %v7745_v41 }
 0x25b   :  { %v7406_v24 = vsub.f32 %v3788_v54, %v3806_v1  ;;  %v3405_v45 = vsub.f32 %v7404_v61, %v3404_v56 }
 0x25d   :  { %6103 = vmatpush3.bf16.msra.mxu1 %v7208_v46  ;;  %6175 = vmatpush3.bf16.msra.mxu0 %v7212_v8  ;;  %v7389_v46 = vand.u32 4294901760, %v3299_v63  ;;  %v3895_v62 = vand.u32 4294901760, %v7406_v24  ;;  %v3406_v50 = vand.u32 4294901760, %v3405_v45 }
 0x25e   :  { %6104 = vmatprep.subr.bf16.mxu1 %v7745_v41  ;;  %6176 = vmatprep.subr.bf16.mxu0 %v7745_v41 }
 0x25f   :  { %v7411_v47 = vsub.f32 %v3299_v63, %v7389_v46  ;;  %v3896_v31 = vsub.f32 %v7406_v24, %v3895_v62 }
 0x261   :  { %6106 = vmatpush3.bf16.msra.mxu1 %v7217_v60  ;;  %6178 = vmatpush3.bf16.msra.mxu0 %v7219_v58  ;;  %v3383_v60 = vand.u32 4294901760, %v7379_v48  ;;  %v7397_v58 = vsub.f32 %v3289_v42, %v3308_v17  ;;  %v3372_v22 = vand.u32 4294901760, %v7411_v47  ;;  %v3897_v53 = vand.u32 4294901760, %v3896_v31 }
 0x262   :  { %6107 = vmatprep.subr.bf16.mxu1 %v7745_v41  ;;  %6179 = vmatprep.subr.bf16.mxu0 %v7745_v41 }
 0x263   :  { %v3397_v30 = vand.u32 4294901760, %v7397_v58  ;;  %v3373_v3 = vsub.f32 %v7411_v47, %v3372_v22  ;;  %v6207_v37 = vpack.c.bf16 %v7404_v61, %v7397_v58 }
 0x264   :  { %5552 = vmatmul.mubr.f32.vlgmr.msra.gmra.mrb[8].mxu1 %v7233_v57  ;;  %5666 = vmatmul.mubr.f32.vlgmr.msra.gmra.mrb[10].mxu0 %v7233_v57 }
 0x265   :  { %6109 = vmatpush3.bf16.msra.mxu1 %v6991_v2  ;;  %6181 = vmatpush3.bf16.msra.mxu0 %v6999_v6  ;;  %v3789_v2 = vld [vmem:[%s7702_s14 + $0x18] sm:$0xff]  ;;  %v7371_v6 = vand.u32 4294901760, %v3797_v26  ;;  %v3398_v15 = vsub.f32 %v7397_v58, %v3397_v30  ;;  %v3374_v23 = vand.u32 4294901760, %v3373_v3 }
 0x266   :  { %6110 = vmatprep.subr.bf16.mxu1 %v7745_v41  ;;  %6182 = vmatprep.subr.bf16.mxu0 %v7745_v41  ;;  %v3809_v18 = vand.u32 4294901760, %v3789_v2 }
 0x267   :  { %5570 = vmatprep.mubr.msk.f32.mxu1 %vm6500_vm0, %v7746_v43  ;;  %5684 = vmatprep.mubr.msk.f32.mxu0 %vm6500_vm0, %v7746_v43  ;;  %v7394_v8 = vsub.f32 %v3797_v26, %v7371_v6  ;;  %v3399_v49 = vand.u32 4294901760, %v3398_v15  ;;  %v4838_v15 = vld [vmem:[%s7705_s17] ss:$0 sm:$0xff] }
 0x268   :  { %v7408_v0 = vsub.f32 %v3789_v2, %v3809_v18  ;;  %v7443_v21 = vpack.c.bf16 %v3809_v18, %v3806_v1  ;;  %v6219_v2 = vpack.c.bf16 %v3404_v56, %v3397_v30 }
 0x269   :  { %6112 = vmatpush3.bf16.msra.mxu1 %v7019_v12  ;;  %6184 = vmatpush3.bf16.msra.mxu0 %v7021_v13  ;;  %v3390_v12 = vand.u32 4294901760, %v7381_v9  ;;  %v3881_v13 = vand.u32 4294901760, %v7383_v20  ;;  %v3870_v10 = vand.u32 4294901760, %v7394_v8  ;;  %v6201_v25 = vpack.c.bf16 %v3406_v50, %v3399_v49 }
 0x26a   :  { %6113 = vmatprep.subr.bf16.mxu1 %v7745_v41  ;;  %6185 = vmatprep.subr.bf16.mxu0 %v7745_v41  ;;  %v3902_v16 = vand.u32 4294901760, %v7408_v0  ;;  %v6243_v42 = vpack.c.bf16 %v7408_v0, %v7406_v24 }
 0x26b   :  { %v3882_v39 = vsub.f32 %v7383_v20, %v3881_v13  ;;  %v6216_v52 = vpack.c.bf16 %v3390_v12, %v3383_v60  ;;  %v6252_v54 = vpack.c.bf16 %v3888_v59, %v3881_v13  ;;  %v4295_v20 = vld [vmem:[%s7707_s19 + $0x10] sm:$0xff] }
 0x26c   :  { %v6255_v63 = vpack.c.bf16 %v3902_v16, %v3895_v62  ;;  %v4314_v32 = vand.u32 4294901760, %v4295_v20 }
 0x26d   :  { %6115 = vmatpush3.bf16.msra.mxu1 %v7039_v28  ;;  %6187 = vmatpush3.bf16.msra.mxu0 %v7041_v29  ;;  %v3384_v28 = vsub.f32 %v7379_v48, %v3383_v60  ;;  %v3391_v29 = vsub.f32 %v7381_v9, %v3390_v12  ;;  %v3883_v40 = vand.u32 4294901760, %v3882_v39  ;;  %v4293_v48 = vld [vmem:[%s7707_s19] sm:$0xff]  ;;  %v4294_v9 = vld [vmem:[%s7707_s19 + $0x8] sm:$0xff] }
 0x26e   :  { %6116 = vmatprep.subr.bf16.mxu1 %v7745_v41  ;;  %6188 = vmatprep.subr.bf16.mxu0 %v7745_v41  ;;  %v4308_v38 = vand.u32 4294901760, %v4293_v48  ;;  %v4311_v17 = vand.u32 4294901760, %v4294_v9  ;;  %v7580_v60 = vsub.f32 %v4295_v20, %v4314_v32 }
 0x26f   :  { %v3392_v27 = vand.u32 4294901760, %v3391_v29  ;;  %v6234_v7 = vpack.c.bf16 %v3890_v14, %v3883_v40  ;;  %v4834_v14 = vld [vmem:[%s7703_s15] ss:$0 sm:$0xff] }
 0x270   :  { %v7574_v18 = vpack.c.bf16 %v4311_v17, %v4308_v38 }
 0x271   :  { %6118 = vmatpush3.bf16.msra.mxu1 %v7076_v35  ;;  %6190 = vmatpush3.bf16.msra.mxu0 %v7090_v51  ;;  %v3871_v35 = vsub.f32 %v7394_v8, %v3870_v10  ;;  %v3385_v51 = vand.u32 4294901760, %v3384_v28 }
 0x272   :  { %6191 = vmatprep.subr.bf16.mxu1 %v7745_v41  ;;  %6227 = vmatprep.subr.bf16.mxu0 %v7745_v41 }
 0x273   :  { %v3872_v4 = vand.u32 4294901760, %v3871_v35  ;;  %v6198_v5 = vpack.c.bf16 %v3392_v27, %v3385_v51 }
 0x274   :  { %5571 = vmatmul.mubr.f32.vlgmr.msra.gmra.mrb[8].mxu1 %v7233_v57  ;;  %5685 = vmatmul.mubr.f32.vlgmr.msra.gmra.mrb[10].mxu0 %v7233_v57  ;;  %v3903_v57 = vsub.f32 %v7408_v0, %v3902_v16 }
 0x275   :  { %6193 = vmatpush3.bf16.msra.mxu1 %v7416_v33  ;;  %6229 = vmatpush3.bf16.msra.mxu0 %v7433_v55 }
 0x276   :  { %6194 = vmatprep.subr.bf16.mxu1 %v7745_v41  ;;  %6230 = vmatprep.subr.bf16.mxu0 %v7745_v41  ;;  %v3904_v19 = vand.u32 4294901760, %v3903_v57 }
 0x277   :  { %5695 = vmatprep.mubr.msk.f32.mxu1 %vm6500_vm0, %v7746_v43  ;;  %5761 = vmatprep.mubr.msk.f32.mxu0 %vm6500_vm0, %v7746_v43 }
 0x278   :  { %v6237_v26 = vpack.c.bf16 %v3904_v19, %v3897_v53 }
 0x279   :  { %6196 = vmatpush3.bf16.msra.mxu1 %v7441_v11  ;;  %6232 = vmatpush3.bf16.msra.mxu0 %v7443_v21 }
 0x27a   :  { %6197 = vmatprep.subr.bf16.mxu1 %v7745_v41  ;;  %6233 = vmatprep.subr.bf16.mxu0 %v7745_v41 }
 0x27c   :  { %5696 = vmatmul.mubr.f32.vlgmr.msra.gmra.mrb[10].mxu1 %v3374_v23  ;;  %5762 = vmatmul.mubr.f32.vlgmr.msra.gmra.mrb[12].mxu0 %v3872_v4 }
 0x27d   :  { %6199 = vmatpush3.bf16.msra.mxu1 %v6198_v5  ;;  %6235 = vmatpush3.bf16.msra.mxu0 %v6234_v7  ;;  %v4836_v7 = vld [vmem:[%s7704_s16] ss:$0 sm:$0xff]  ;;  %s6502_s16 = smov [#allocation8]  }
 0x27e   :  { %6200 = vmatprep.subr.bf16.mxu1 %v7745_v41  ;;  %6236 = vmatprep.subr.bf16.mxu0 %v7745_v41 }
 0x27f   :  { %5706 = vmatprep.mubr.msk.f32.mxu1 %vm6500_vm0, %v7746_v43  ;;  %5772 = vmatprep.mubr.msk.f32.mxu0 %vm6500_vm0, %v7746_v43 }
 0x281   :  { %6202 = vmatpush3.bf16.msra.mxu1 %v6201_v25  ;;  %6238 = vmatpush3.bf16.msra.mxu0 %v6237_v26 }
 0x282   :  { %6203 = vmatprep.subr.bf16.mxu1 %v7745_v41  ;;  %6239 = vmatprep.subr.bf16.mxu0 %v7745_v41 }
 0x284   :  { %5707 = vmatmul.mubr.f32.vlgmr.msra.gmra.mrb[12].mxu1 %v7389_v46  ;;  %5773 = vmatmul.mubr.f32.vlgmr.msra.gmra.mrb[12].mxu0 %v7371_v6 }
 0x285   :  { %6205 = vmatpush3.bf16.msra.mxu1 %v6204_v34  ;;  %6241 = vmatpush3.bf16.msra.mxu0 %v6240_v36 }
 0x286   :  { %6206 = vmatprep.subr.bf16.mxu1 %v7745_v41  ;;  %6242 = vmatprep.subr.bf16.mxu0 %v7745_v41 }
 0x287   :  { %5717 = vmatprep.mubr.msk.f32.mxu1 %vm6500_vm0, %v7746_v43  ;;  %5783 = vmatprep.mubr.msk.f32.mxu0 %vm6500_vm0, %v7746_v43 }
 0x289   :  { %6208 = vmatpush3.bf16.msra.mxu1 %v6207_v37  ;;  %6244 = vmatpush3.bf16.msra.mxu0 %v6243_v42 }
 0x28a   :  { %6209 = vmatprep.subr.bf16.mxu1 %v7745_v41  ;;  %6245 = vmatprep.subr.bf16.mxu0 %v7745_v41 }
 0x28c   :  { %5718 = vmatmul.mubr.f32.vlgmr.msra.gmra.mrb[14].mxu1 %v7411_v47  ;;  %5784 = vmatmul.mubr.f32.vlgmr.msra.gmra.mrb[12].mxu0 %v7394_v8  ;;  %v7578_v8 = vsub.f32 %v4294_v9, %v4311_v17 }
 0x28d   :  { %6211 = vmatpush3.bf16.msra.mxu1 %v7416_v33  ;;  %6247 = vmatpush3.bf16.msra.mxu0 %v7433_v55 }
 0x28e   :  { %6212 = vmatprep.subr.bf16.mxu1 %v7745_v41  ;;  %6248 = vmatprep.subr.bf16.mxu0 %v7745_v41  ;;  %v4396_v59 = vand.u32 4294901760, %v7578_v8 }
 0x28f   :  { %5728 = vmatprep.mubr.msk.f32.mxu1 %vm6500_vm0, %v7746_v43  ;;  %5794 = vmatprep.mubr.msk.f32.mxu0 %vm6500_vm0, %v7746_v43 }
 0x290   :  { %v4397_v24 = vsub.f32 %v7578_v8, %v4396_v59 }
 0x291   :  { %6214 = vmatpush3.bf16.msra.mxu1 %v7441_v11  ;;  %6250 = vmatpush3.bf16.msra.mxu0 %v7443_v21 }
 0x292   :  { %6215 = vmatprep.subr.bf16.mxu1 %v7745_v41  ;;  %6251 = vmatprep.subr.bf16.mxu0 %v7745_v41  ;;  %v4398_v47 = vand.u32 4294901760, %v4397_v24 }
 0x294   :  { %5729 = vmatmul.mubr.f32.vlgmr.msra.gmra.mrb[16].mxu1 %v3372_v22  ;;  %5795 = vmatmul.mubr.f32.vlgmr.msra.gmra.mrb[12].mxu0 %v3870_v10  ;;  %v4403_v10 = vand.u32 4294901760, %v7580_v60 }
 0x295   :  { %6217 = vmatpush3.bf16.msra.mxu1 %v6216_v52  ;;  %6253 = vmatpush3.bf16.msra.mxu0 %v6252_v54 }
 0x296   :  { %6218 = vmatprep.subr.bf16.mxu1 %v7745_v41  ;;  %6254 = vmatprep.subr.bf16.mxu0 %v7745_v41  ;;  %v4404_v29 = vsub.f32 %v7580_v60, %v4403_v10 }
 0x297   :  { %5739 = vmatprep.mubr.msk.f32.mxu1 %vm6500_vm0, %v7746_v43  ;;  %5805 = vmatprep.mubr.msk.f32.mxu0 %vm6500_vm0, %v7746_v43 }
 0x298   :  { %v4405_v44 = vand.u32 4294901760, %v4404_v29 }
 0x299   :  { %6220 = vmatpush3.bf16.msra.mxu1 %v6219_v2  ;;  %6256 = vmatpush3.bf16.msra.mxu0 %v6255_v63  ;;  %v4839_v63 = vld [vmem:[%s7706_s18] ss:$0 sm:$0xff]  ;;  %s4808_s18 = sshll.u32 %s6502_s16, 4  ;;  %s4809_s18 = int_to_ptr.vmem [resolvable:$true] %s4808_s18 }
 0x29a   :  { %6221 = vmatprep.subr.bf16.mxu1 %v7745_v41  ;;  %6257 = vmatprep.subr.bf16.mxu0 %v7745_v41  ;;  %s6442_s27 = scalar_lea.vmem %s4809_s18, 64  ;;  %p6447_p0 = scmp.lt.s32.totalorder %s4809_s18, %s4809_s18 }
 0x29b   :  { %p6443_p13 = scmp.ne.s32.totalorder %s4809_s18, %s6442_s27  ;;  %p6448_p1 = scmp.lt.s32.totalorder %s6442_s27, %s6442_s27 }
 0x29c   :  { %5740 = vmatmul.mubr.f32.vlgmr.msra.gmra.mrb[18].mxu1 %v7389_v46  ;;  %5806 = vmatmul.mubr.f32.vlgmr.msra.gmra.mrb[12].mxu0 %v7371_v6 }
 0x29d   :  { %6223 = vmatpush3.bf16.msra.mxu1 %v7416_v33  ;;  %6259 = vmatpush3.bf16.msra.mxu0 %v7433_v55  ;;  %p6449_p2 = por %p6448_p1, %p6447_p0 }
 0x29e   :  { %6224 = vmatprep.subr.bf16.mxu1 %v7745_v41  ;;  %6260 = vmatprep.subr.bf16.mxu0 %v7745_v41 }
 0x29f   :  { %5750 = vmatprep.mubr.msk.f32.mxu1 %vm6500_vm0, %v7746_v43  ;;  %5816 = vmatprep.mubr.msk.f32.mxu0 %vm6500_vm0, %v7746_v43  ;;  %p6450_p3 = pnand %p6449_p2, %p6443_p13 }
 0x2a1   :  { %6226 = vmatpush3.bf16.msra.mxu1 %v7441_v11  ;;  %6262 = vmatpush3.bf16.msra.mxu0 %v7443_v21 }
 0x2a2   :  { %6263 = vmatprep.subr.bf16.mxu1 %v7745_v41 }
 0x2a4   :  { %5751 = vmatmul.mubr.f32.vlgmr.msra.gmra.mrb[20].mxu1 %v7389_v46  ;;  %5817 = vmatmul.mubr.f32.vlgmr.msra.gmra.mrb[12].mxu0 %v7371_v6  ;;  %v4296_v6 = vld [vmem:[%s7707_s19 + $0x18] sm:$0xff]  ;;  %v7576_v46 = vsub.f32 %v4293_v48, %v4308_v38 }
 0x2a5   :  { %5827 = vmatprep.mubr.msk.f32.mxu1 %vm6500_vm0, %v7746_v43  ;;  %v4317_v1 = vand.u32 4294901760, %v4296_v6  ;;  %6265 = vmatpush3.bf16.msra.mxu1 %v7574_v18 }
 0x2a6   :  { %6266 = vmatprep.subr.bf16.mxu1 %v7745_v41  ;;  %v4389_v13 = vand.u32 4294901760, %v7576_v46  ;;  %v6276_v56 = vpack.c.bf16 %v7578_v8, %v7576_v46 }
 0x2a7   :  { %v7582_v58 = vsub.f32 %v4296_v6, %v4317_v1  ;;  %v7585_v12 = vpack.c.bf16 %v4317_v1, %v4314_v32 }
 0x2a8   :  { %v4390_v61 = vsub.f32 %v7576_v46, %v4389_v13  ;;  %v7606_v16 = vpack.c.bf16 %v4396_v59, %v4389_v13 }
 0x2a9   :  { %6268 = vmatpush3.bf16.msra.mxu1 %v7585_v12  ;;  %v4410_v33 = vand.u32 4294901760, %v7582_v58  ;;  %v6279_v62 = vpack.c.bf16 %v7582_v58, %v7580_v60 }
 0x2aa   :  { %6269 = vmatprep.subr.bf16.mxu1 %v7745_v41  ;;  %v4391_v0 = vand.u32 4294901760, %v4390_v61 }
 0x2ab   :  { %v4411_v39 = vsub.f32 %v7582_v58, %v4410_v33  ;;  %v7608_v22 = vpack.c.bf16 %v4410_v33, %v4403_v10 }
 0x2ac   :  { %v7596_v28 = vpack.c.bf16 %v4398_v47, %v4391_v0  ;;  %v6407_v47 = vld [vmem:[#allocation6 + $0x2] sm:$0x3] }
 0x2ad   :  { %v4412_v30 = vand.u32 4294901760, %v4411_v39 }
 0x2af   :  { %v7600_v55 = vpack.c.bf16 %v4412_v30, %v4405_v44 }
 0x347   :  { %v2719_v11 = vpop.f32.mrb[8].mxu1  ;;  %v3277_v21 = vpop.f32.mrb[10].mxu0 }
 0x348   :  { %v5572_v35 = vpop.f32.mrb[9].mxu1  ;;  %v5686_v51 = vpop.f32.mrb[11].mxu0  ;;  %v6302_v45 = vadd.f32 %v4834_v14, %v2719_v11  ;;  %v6303_v19 = vadd.f32 %v4836_v7, %v3277_v21 }
 0x34a   :  { %v4835_v5 = vmul.f32 -1.442695, %v6302_v45  ;;  %v4837_v23 = vmul.f32 -1.442695, %v6303_v19 }
 0x34c   :  { %6396 = vpow2.f32 %v4835_v5 }
 0x34d   :  { %6398 = vpow2.f32 %v4837_v23 }
 0x34f   :  { %v3376_v27 = vpop.f32.mrb[10].mxu1 }
 0x350   :  { %v5697_v40 = vpop.f32.mrb[11].mxu1  ;;  %v3377_v31 = vadd.f32 %v4838_v15, %v3376_v27 }
 0x356   :  { %v6397_v26 = vpop.eup %6396 }
 0x357   :  { %v3467_v57 = vpop.f32.mrb[12].mxu1  ;;  %v2726_v37 = vadd.f32 1.0, %v6397_v26  ;;  %v6399_v2 = vpop.eup %6398 }
 0x358   :  { %v3468_v3 = vadd.f32 %v3467_v57, %v3377_v31  ;;  %v5708_v4 = vpop.f32.mrb[13].mxu1  ;;  %v3284_v48 = vadd.f32 1.0, %v6399_v2 }
 0x359   :  { %6400 = vrcp.f32 %v2726_v37 }
 0x35a   :  { %6402 = vrcp.f32 %v3284_v48 }
 0x35f   :  { %v3547_v49 = vpop.f32.mrb[14].mxu1 }
 0x360   :  { %v3548_v50 = vadd.f32 %v3547_v49, %v3468_v3  ;;  %v5719_v53 = vpop.f32.mrb[15].mxu1 }
 0x363   :  { %v6401_v1 = vpop.eup %6400 }
 0x364   :  { %v6403_v61 = vpop.eup %6402 }
 0x365   :  { %v4287_v24 = vsub.f32 1.0, %v6403_v61  ;;  %v4289_v10 = vmul.f32 %v6407_v47, %v6403_v61 }
 0x367   :  { %v3624_v25 = vpop.f32.mrb[16].mxu1 }
 0x368   :  { %v3625_v34 = vadd.f32 %v3624_v25, %v3548_v50  ;;  %v5730_v36 = vpop.f32.mrb[17].mxu1 }
 0x36f   :  { %v3707_v42 = vpop.f32.mrb[18].mxu1 }
 0x370   :  { %v3708_v52 = vadd.f32 %v3707_v42, %v3625_v34  ;;  %v5741_v54 = vpop.f32.mrb[19].mxu1 }
 0x377   :  { %v3782_v9 = vpop.f32.mrb[20].mxu1  ;;  %v4280_v20 = vpop.f32.mrb[12].mxu0 }
 0x378   :  { %v3783_v38 = vadd.f32 %v3782_v9, %v3708_v52  ;;  %v6304_v17 = vadd.f32 %v4839_v63, %v4280_v20  ;;  %v5752_v6 = vpop.f32.mrb[21].mxu1  ;;  %v5818_v32 = vpop.f32.mrb[13].mxu0 }
 0x37a   :  { %v4284_v13 = vmul.f32 %v6401_v1, %v6304_v17 }
 0x37c   :  { %v4285_v59 = vadd.f32 %v4284_v13, %v3783_v38 }
 0x37e   :  { %6404 = vtanh.f32 %v4285_v59 }
 0x388   :  { %v6405_v0 = vpop.eup %6404 }
 0x389   :  { %v4288_v33 = vmul.f32 %v6405_v0, %v4287_v24 }
 0x38b   :  { %v4290_v29 = vadd.f32 %v4289_v10, %v4288_v33 }
 0x38d   :  { %v4305_v39 = vsel %vm1663_vm4, %v4290_v29, 0  ;;  %4292 = vst.msk [vmem:[#allocation8 + $0x2] sm:$0x3] %vm2158_vm5, %v4290_v29 }
 0x38e   :  { %v4376_v44 = vand.u32 4294901760, %v4305_v39 }
 0x390   :  { %v4377_v30 = vsub.f32 %v4305_v39, %v4376_v44 }
 0x392   :  { %v4378_v11 = vand.u32 4294901760, %v4377_v30 }
 0x394   :  { %v4379_v21 = vsub.f32 %v4377_v30, %v4378_v11 }
 0x396   :  { %v4380_v35 = vand.u32 4294901760, %v4379_v21 }
 0x398   :  { %5828 = vmatmul.mubr.f32.vlgmr.msra.gmra.mrb[22].mxu1 %v4380_v35 }
 0x399   :  { %6271 = vmatpush3.bf16.msra.mxu1 %v7596_v28  ;;  %5838 = vmatprep.mubr.msk.f32.mxu1 %vm6500_vm0, %v7746_v43 }
 0x39a   :  { %6272 = vmatprep.subr.bf16.mxu1 %v7745_v41 }
 0x39d   :  { %6274 = vmatpush3.bf16.msra.mxu1 %v7600_v55 }
 0x39e   :  { %6275 = vmatprep.subr.bf16.mxu1 %v7745_v41 }
 0x3a0   :  { %5839 = vmatmul.mubr.f32.vlgmr.msra.gmra.mrb[22].mxu1 %v4376_v44 }
 0x3a1   :  { %6277 = vmatpush3.bf16.msra.mxu1 %v6276_v56  ;;  %5849 = vmatprep.mubr.msk.f32.mxu1 %vm6500_vm0, %v7746_v43 }
 0x3a2   :  { %6278 = vmatprep.subr.bf16.mxu1 %v7745_v41 }
 0x3a5   :  { %6280 = vmatpush3.bf16.msra.mxu1 %v6279_v62 }
 0x3a6   :  { %6281 = vmatprep.subr.bf16.mxu1 %v7745_v41 }
 0x3a8   :  { %5850 = vmatmul.mubr.f32.vlgmr.msra.gmra.mrb[22].mxu1 %v4377_v30 }
 0x3a9   :  { %6283 = vmatpush3.bf16.msra.mxu1 %v7574_v18  ;;  %5860 = vmatprep.mubr.msk.f32.mxu1 %vm6500_vm0, %v7746_v43 }
 0x3aa   :  { %6284 = vmatprep.subr.bf16.mxu1 %v7745_v41 }
 0x3ad   :  { %6286 = vmatpush3.bf16.msra.mxu1 %v7585_v12 }
 0x3ae   :  { %6287 = vmatprep.subr.bf16.mxu1 %v7745_v41 }
 0x3b0   :  { %5861 = vmatmul.mubr.f32.vlgmr.msra.gmra.mrb[22].mxu1 %v4378_v11 }
 0x3b1   :  { %6289 = vmatpush3.bf16.msra.mxu1 %v7606_v16  ;;  %5871 = vmatprep.mubr.msk.f32.mxu1 %vm6500_vm0, %v7746_v43 }
 0x3b2   :  { %6290 = vmatprep.subr.bf16.mxu1 %v7745_v41 }
 0x3b5   :  { %6292 = vmatpush3.bf16.msra.mxu1 %v7608_v22 }
 0x3b6   :  { %6293 = vmatprep.subr.bf16.mxu1 %v7745_v41 }
 0x3b8   :  { %5872 = vmatmul.mubr.f32.vlgmr.msra.gmra.mrb[22].mxu1 %v4376_v44 }
 0x3b9   :  { %6295 = vmatpush3.bf16.msra.mxu1 %v7574_v18  ;;  %5882 = vmatprep.mubr.msk.f32.mxu1 %vm6500_vm0, %v7746_v43 }
 0x3ba   :  { %6296 = vmatprep.subr.bf16.mxu1 %v7745_v41 }
 0x3bd   :  { %6298 = vmatpush3.bf16.msra.mxu1 %v7585_v12 }
 0x3c0   :  { %5883 = vmatmul.mubr.f32.vlgmr.msra.gmra.mrb[22].mxu1 %v4376_v44 }
 0x3c1   :  { %6453 = shalt.err (!%p6450_p3)
}
 0x3c2   :  { %s6454_s11 = scalar_lea.hbm %s7710_s22, 64 }
 0x3c3   :  { %p6455_p4 = scmp.ne.s32.totalorder %s7710_s22, %s6454_s11  ;;  %p6458_p5 = scmp.lt.u32.totalorder %s6454_s11, %s7710_s22 }
 0x3c5   :  { %p6460_p6 = pnand %p6458_p5, %p6455_p4 }
 0x3c7   :  { %6463 = shalt.err (!%p6460_p6)
}
 0x3c8   :  { %4814 = dma.vmem_to_hbm [thread:$0]  %s4809_s18, 64, %s7710_s22, [#allocation9], %s6496_s29, %s6496_s29, %s6497_s30  }
 0x3c9   :  { %v4840_v41 = vld [vmem:[%s7708_s20] ss:$0 sm:$0xff]  ;;  %s6503_s7 = smov [#allocation7]  }
 0x3ca   :  { %s4799_s8 = sshll.u32 %s6503_s7, 4  ;;  %s4800_s8 = int_to_ptr.vmem [resolvable:$true] %s4799_s8 }
 0x3cb   :  { %s6464_s10 = scalar_lea.vmem %s4800_s8, 32  ;;  %p6469_p8 = scmp.lt.s32.totalorder %s4800_s8, %s4800_s8 }
 0x3cc   :  { %p6465_p7 = scmp.ne.s32.totalorder %s4800_s8, %s6464_s10  ;;  %p6470_p9 = scmp.lt.s32.totalorder %s6464_s10, %s6464_s10 }
 0x3ce   :  { %p6471_p10 = por %p6470_p9, %p6469_p8 }
 0x3d0   :  { %p6472_p11 = pnand %p6471_p10, %p6465_p7 }
 0x493   :  { %v4788_v43 = vpop.f32.mrb[22].mxu1 }
 0x494   :  { %v6305_v18 = vadd.f32 %v4840_v41, %v4788_v43  ;;  %v5884_v46 = vpop.f32.mrb[23].mxu1 }
 0x496   :  { %4792 = vst.msk [vmem:[#allocation7] sm:$0x3] %vm2158_vm5, %v6305_v18 }
 0x497   :  { %6475 = shalt.err (!%p6472_p11)
}
 0x498   :  { %s6476_s30 = scalar_lea.hbm %s7709_s21, 32 }
 0x499   :  { %p6477_p12 = scmp.ne.s32.totalorder %s7709_s21, %s6476_s30  ;;  %p6480_p13 = scmp.lt.u32.totalorder %s6476_s30, %s7709_s21 }
 0x49b   :  { %p6482_p0 = pnand %p6480_p13, %p6477_p12 }
 0x49d   :  { %6485 = shalt.err (!%p6482_p0)
}
 0x49e   :  { %4802 = dma.vmem_to_hbm [thread:$0]  %s4800_s8, 32, %s7709_s21, [#allocation4]  }
 0x49f   :  { %6490 = dma.done.wait [#allocation4], 32  }
 0x4a0   :  { %6491 = vsyncadd [#allocation4], 4294967264 }
 0x4a1   :  { %6492 = dma.done.wait [#allocation9], 64  }
 0x4a2   :  { %6493 = vsyncadd [#allocation9], 4294967232 }
 0x4a3   :  { %4821 = vsyncpa [#allocation3], 1 }
 0x4a4   :  { %4822 = vsyncpa [#allocation4], 1 }
 0x4a5   :  { %4823 = vsyncpa [#allocation9], 1 }
 0x4a6   :  { %4824 = vsyncpa [#allocation5], 1 }

</bundles_post_ra>
